<compile_context>
chip_gen: v5e
topology: v5e:2x2
jax: 0.10.0
libtpu: 0.0.40
codegen_flags: <defaults>
</compile_context>

<pallas_src>
import math
from functools import partial

import jax
import jax.numpy as jnp
from jax.experimental import pallas as pl
from jax.experimental.pallas import tpu as pltpu


# ----------------------------------------------------------------------------
# Fused whole-network kernel
# ----------------------------------------------------------------------------
def _make_fused_kernel(H, W, C, depth, L):
    """depth = conv layers per block, L = total conv layers (= block * depth)."""

    def kernel(x_ref, w_ref, shift_ref, out_ref, h_ref, xb_ref):
        # x_ref     : (H, W, C)        block input image (per batch element)
        # w_ref     : (3, 3C, C)       this layer's dx-stacked, BN-folded weights
        # shift_ref : (1, C)           this layer's folded BN shift (0 for final)
        # out_ref   : (H, W, C)        network output (written on last layer)
        # h_ref     : (H+2, W+2, C)    VMEM: current activation, zero halo
        # xb_ref    : (H, W, C)        VMEM: current block's input (for residual)
        l = pl.program_id(1)

        @pl.when(l == 0)
        def _init():
            h_ref[...] = jnp.zeros((H + 2, W + 2, C), jnp.float32)
            xin = x_ref[...]
            h_ref[1:H + 1, 1:W + 1, :] = xin
            xb_ref[...] = xin

        xs = h_ref[...]                                        # (H+2, W+2, C)
        # Stack the three dx taps along the channel/contraction axis, then
        # flatten rows so each dy tap is a contiguous, sublane-aligned row
        # slice of a single (rows, 3C) matrix.
        xcat = jnp.concatenate(
            [xs[:, 0:W, :], xs[:, 1:W + 1, :], xs[:, 2:W + 2, :]], axis=-1
        )                                                      # (H+2, W, 3C)
        xflat = xcat.reshape((H + 2) * W, 3 * C)

        acc = jnp.dot(xflat[0:H * W], w_ref[0],
                      preferred_element_type=jnp.float32)
        acc = acc + jnp.dot(xflat[W:W + H * W], w_ref[1],
                            preferred_element_type=jnp.float32)
        acc = acc + jnp.dot(xflat[2 * W:2 * W + H * W], w_ref[2],
                            preferred_element_type=jnp.float32)
        # Folded BN shift (conv "bias") as a broadcast add.
        y = (acc + shift_ref[...]).reshape(H, W, C)

        is_block_final = (l % depth) == (depth - 1)

        @pl.when(jnp.logical_not(is_block_final))
        def _mid():
            # Conv + BN + ReLU layer: write the activated output back.
            h_ref[1:H + 1, 1:W + 1, :] = jnp.maximum(y, 0.0)

        @pl.when(is_block_final)
        def _fin():
            # Final conv of the block: residual subtraction x_new = x_block - conv.
            v = xb_ref[...] - y
            h_ref[1:H + 1, 1:W + 1, :] = v
            xb_ref[...] = v

        @pl.when(l == L - 1)
        def _write_output():
            out_ref[...] = xb_ref[...].astype(out_ref.dtype)

    return kernel


# ----------------------------------------------------------------------------
# Parameter packing: fold BN scale into weights, pad channels, stack taps/layers
# ----------------------------------------------------------------------------
def _pack_params(params, image_channels, filters):
    C = max(filters, image_channels)
    w_list, s_list = [], []
    for layers in params:
        for (w, scale, shift) in layers:
            cin, cout = w.shape[2], w.shape[3]
            wf = w.astype(jnp.float32) * scale.astype(jnp.float32)[None, None, None, :]
            wp = jnp.zeros((3, 3, C, C), jnp.float32).at[:, :, :cin, :cout].set(wf)
            # (dy, dx, i, o) -> (dy, dx*C + i, o): rows ordered dx-major to match
            # the kernel's dx-concatenated patches.
            w_list.append(wp.reshape(3, 3 * C, C))
            sp = jnp.zeros((C,), jnp.float32).at[:cout].set(shift.astype(jnp.float32))
            s_list.append(sp)
    wstack = jnp.stack(w_list)                       # (L, 3, 3C, C)
    sstack = jnp.stack(s_list).reshape(-1, 1, C)     # (L, 1, C)
    return wstack, sstack


# ----------------------------------------------------------------------------
# Forward pass (single pallas_call) and a pure-JAX reference
# ----------------------------------------------------------------------------
@partial(jax.jit, static_argnames=("image_channels", "filters"))
def dncnn_multiblock_forward(x_nchw, params, *, image_channels, filters):
    nblocks = len(params)
    depth = len(params[0])              # conv layers per block
    L = nblocks * depth
    C = max(filters, image_channels)

    N, Ci, H, W = x_nchw.shape
    x = jnp.transpose(x_nchw, (0, 2, 3, 1)).astype(jnp.float32)   # NHWC
    if Ci < C:
        x = jnp.pad(x, ((0, 0), (0, 0), (0, 0), (0, C - Ci)))

    wstack, sstack = _pack_params(params, image_channels, filters)
    kernel = _make_fused_kernel(H, W, C, depth, L)

    flops = 2 * N * L * 9 * H * W * C * C
    bytes_accessed = (
        2 * N * H * W * C * 4 + wstack.size * 4 + sstack.size * 4
    )

    out = pl.pallas_call(
        kernel,
        out_shape=jax.ShapeDtypeStruct((N, H, W, C), jnp.float32),
        grid_spec=pltpu.PrefetchScalarGridSpec(
            num_scalar_prefetch=0,
            grid=(N, L),
            in_specs=[
                pl.BlockSpec((None, H, W, C), lambda n, l: (n, 0, 0, 0)),
                pl.BlockSpec((None, 3, 3 * C, C), lambda n, l: (l, 0, 0, 0)),
                pl.BlockSpec((None, 1, C), lambda n, l: (l, 0, 0)),
            ],
            out_specs=pl.BlockSpec((None, H, W, C), lambda n, l: (n, 0, 0, 0)),
            scratch_shapes=[
                pltpu.VMEM((H + 2, W + 2, C), jnp.float32),   # activation + halo
                pltpu.VMEM((H, W, C), jnp.float32),           # block input
            ],
        ),
        compiler_params=pltpu.CompilerParams(
            dimension_semantics=("parallel", "arbitrary"),
        ),
        input_output_aliases={0: 0},
        cost_estimate=pl.CostEstimate(
            flops=flops, transcendentals=0, bytes_accessed=bytes_accessed
        ),
    )(x, wstack, sstack)

    out = out[..., :image_channels]
    return jnp.transpose(out, (0, 3, 1, 2))          # back to NCHW


def dncnn_multiblock_reference(x_nchw, params):
    x = jnp.transpose(x_nchw, (0, 2, 3, 1))
    for layers in params:
        h = x
        for i, (w, scale, shift) in enumerate(layers):
            y = jax.lax.conv_general_dilated(
                h, w, (1, 1), "SAME",
                dimension_numbers=("NHWC", "HWIO", "NHWC"),
            )
            y = y * scale + shift
            if i < len(layers) - 1:
                y = jnp.maximum(y, 0.0)
            h = y
        x = x - h
    return jnp.transpose(x, (0, 3, 1, 2))


# ----------------------------------------------------------------------------
# Parameter init (deterministic, mirrors nn.Conv2d / nn.BatchNorm2d eval mode)
# ----------------------------------------------------------------------------
def init_params(key, block, depth, image_channels, filters, eps=1e-4):
    params = []
    for _ in range(block):
        layers = []
        for i in range(depth - 1):
            in_ch = image_channels if i == 0 else filters
            key, k1, k2, k3, k4, k5 = jax.random.split(key, 6)
            w = jax.random.normal(k1, (3, 3, in_ch, filters), jnp.float32) * (
                1.0 / math.sqrt(9 * in_ch)
            )
            gamma = 1.0 + 0.1 * jax.random.normal(k2, (filters,), jnp.float32)
            beta = 0.1 * jax.random.normal(k3, (filters,), jnp.float32)
            rmean = 0.1 * jax.random.normal(k4, (filters,), jnp.float32)
            rvar = 1.0 + 0.1 * jnp.abs(
                jax.random.normal(k5, (filters,), jnp.float32)
            )
            scale = gamma / jnp.sqrt(rvar + eps)
            shift = beta - rmean * scale
            layers.append((w, scale, shift))
        key, kf = jax.random.split(key)
        wf = jax.random.normal(
            kf, (3, 3, filters, image_channels), jnp.float32
        ) * (1.0 / math.sqrt(9 * filters))
        layers.append(
            (
                wf,
                jnp.ones((image_channels,), jnp.float32),
                jnp.zeros((image_channels,), jnp.float32),
            )
        )
        params.append(layers)
    return params


if __name__ == "__main__":
    # Small config consistent with the module's constructor arguments.
    BLOCK, DEPTH, IMAGE_CHANNELS, FILTERS = 3, 4, 2, 16
    N, H, W = 2, 16, 16

    key = jax.random.PRNGKey(0)
    key, kx = jax.random.split(key)
    x = jax.random.normal(kx, (N, IMAGE_CHANNELS, H, W), jnp.float32)  # NCHW

    params = init_params(key, BLOCK, DEPTH, IMAGE_CHANNELS, FILTERS)

    out = dncnn_multiblock_forward(
        x, params, image_channels=IMAGE_CHANNELS, filters=FILTERS
    )
    out = jax.block_until_ready(out)

    ref = jax.block_until_ready(dncnn_multiblock_reference(x, params))
    assert out.shape == (N, IMAGE_CHANNELS, H, W)
    assert jnp.allclose(out, ref, atol=2e-3, rtol=2e-3)

    print("KERNEL_OK")
</pallas_src>

<mosaic_0001>
module attributes {stable_mosaic.version = 11 : i64} {
  func.func @kernel(%arg0: i32, %arg1: i32, %arg2: memref<1x16x16x16xf32, #tpu.memory_space<vmem>>, %arg3: memref<1x3x48x16xf32, #tpu.memory_space<vmem>>, %arg4: memref<1x1x16xf32, #tpu.memory_space<vmem>>, %arg5: memref<1x16x16x16xf32, #tpu.memory_space<vmem>>, %arg6: memref<18x18x16xf32, #tpu.memory_space<vmem>>, %arg7: memref<16x16x16xf32, #tpu.memory_space<vmem>>) attributes {dimension_semantics = [#tpu.dimension_semantics<parallel>, #tpu.dimension_semantics<arbitrary>], iteration_bounds = array<i64: 2, 12>, scalar_prefetch = 0 : i64, scratch_operands = 2 : i64, tpu.core_type = #tpu.core_type<tc>, window_params = [{transform_indices = @transform_0, window_bounds = array<i64: 1, 16, 16, 16>}, {transform_indices = @transform_1, window_bounds = array<i64: 1, 3, 48, 16>}, {transform_indices = @transform_2, window_bounds = array<i64: 1, 1, 16>}, {transform_indices = @transform_3, window_bounds = array<i64: 1, 16, 16, 16>}]} {
    %c0_i32 = arith.constant 0 : i32
    %0 = arith.cmpi eq, %arg1, %c0_i32 : i32
    %1 = arith.extui %0 : i1 to i32
    %c0_i32_0 = arith.constant 0 : i32
    %2 = arith.cmpi ne, %1, %c0_i32_0 : i32
    scf.if %2 {
      %cst_25 = arith.constant 0.000000e+00 : f32
      %47 = vector.broadcast %cst_25 : f32 to vector<18x18x16xf32>
      %c0_26 = arith.constant 0 : index
      %c0_27 = arith.constant 0 : index
      %c0_28 = arith.constant 0 : index
      %48 = vector.load %arg6[%c0_26, %c0_27, %c0_28] : memref<18x18x16xf32, #tpu.memory_space<vmem>>, vector<18x18x16xf32>
      tpu.vector_store %arg6[%c0_26, %c0_27, %c0_28], %47 {strides = array<i32>} : memref<18x18x16xf32, #tpu.memory_space<vmem>>, vector<18x18x16xf32>,
      %c0_29 = arith.constant 0 : index
      %c0_30 = arith.constant 0 : index
      %c0_31 = arith.constant 0 : index
      %c0_32 = arith.constant 0 : index
      %49 = vector.load %arg2[%c0_29, %c0_30, %c0_31, %c0_32] : memref<1x16x16x16xf32, #tpu.memory_space<vmem>>, vector<1x16x16x16xf32>
      %50 = vector.shape_cast %49 : vector<1x16x16x16xf32> to vector<16x16x16xf32>
      %c1_33 = arith.constant 1 : index
      %c1_34 = arith.constant 1 : index
      %c0_35 = arith.constant 0 : index
      %51 = vector.load %arg6[%c1_33, %c1_34, %c0_35] : memref<18x18x16xf32, #tpu.memory_space<vmem>>, vector<16x16x16xf32>
      tpu.vector_store %arg6[%c1_33, %c1_34, %c0_35], %50 {strides = array<i32>} : memref<18x18x16xf32, #tpu.memory_space<vmem>>, vector<16x16x16xf32>,
      %c0_36 = arith.constant 0 : index
      %c0_37 = arith.constant 0 : index
      %c0_38 = arith.constant 0 : index
      %52 = vector.load %arg7[%c0_36, %c0_37, %c0_38] : memref<16x16x16xf32, #tpu.memory_space<vmem>>, vector<16x16x16xf32>
      tpu.vector_store %arg7[%c0_36, %c0_37, %c0_38], %50 {strides = array<i32>} : memref<16x16x16xf32, #tpu.memory_space<vmem>>, vector<16x16x16xf32>,
    } else {
    }
    %c0 = arith.constant 0 : index
    %c0_1 = arith.constant 0 : index
    %c0_2 = arith.constant 0 : index
    %3 = vector.load %arg6[%c0, %c0_1, %c0_2] : memref<18x18x16xf32, #tpu.memory_space<vmem>>, vector<18x18x16xf32>
    %4 = vector.extract_strided_slice %3 {offsets = [0, 0, 0], sizes = [18, 16, 16], strides = [1, 1, 1]} : vector<18x18x16xf32> to vector<18x16x16xf32>
    %5 = vector.extract_strided_slice %3 {offsets = [0, 1, 0], sizes = [18, 16, 16], strides = [1, 1, 1]} : vector<18x18x16xf32> to vector<18x16x16xf32>
    %6 = vector.extract_strided_slice %3 {offsets = [0, 2, 0], sizes = [18, 16, 16], strides = [1, 1, 1]} : vector<18x18x16xf32> to vector<18x16x16xf32>
    %7 = tpu.concatenate %4, %5, %6 in 2 : vector<18x16x16xf32>, vector<18x16x16xf32>, vector<18x16x16xf32> -> vector<18x16x48xf32>
    %8 = vector.shape_cast %7 : vector<18x16x48xf32> to vector<288x48xf32>
    %9 = vector.extract_strided_slice %8 {offsets = [0, 0], sizes = [256, 48], strides = [1, 1]} : vector<288x48xf32> to vector<256x48xf32>
    %c0_3 = arith.constant 0 : index
    %c0_4 = arith.constant 0 : index
    %c0_5 = arith.constant 0 : index
    %c0_6 = arith.constant 0 : index
    %10 = vector.load %arg3[%c0_3, %c0_4, %c0_5, %c0_6] : memref<1x3x48x16xf32, #tpu.memory_space<vmem>>, vector<1x1x48x16xf32>
    %11 = vector.shape_cast %10 : vector<1x1x48x16xf32> to vector<48x16xf32>
    %cst = arith.constant dense<0.000000e+00> : vector<256x16xf32>
    %12 = tpu.matmul %9, %11, %cst {dimension_numbers = #tpu.dot_dimension_numbers<[1], [0], [0], [1], [0, 0, 1, 1], [], []>} : vector<256x48xf32>, vector<48x16xf32>, vector<256x16xf32> -> vector<256x16xf32>
    %13 = vector.extract_strided_slice %8 {offsets = [16, 0], sizes = [256, 48], strides = [1, 1]} : vector<288x48xf32> to vector<256x48xf32>
    %c0_7 = arith.constant 0 : index
    %c1 = arith.constant 1 : index
    %c0_8 = arith.constant 0 : index
    %c0_9 = arith.constant 0 : index
    %14 = vector.load %arg3[%c0_7, %c1, %c0_8, %c0_9] : memref<1x3x48x16xf32, #tpu.memory_space<vmem>>, vector<1x1x48x16xf32>
    %15 = vector.shape_cast %14 : vector<1x1x48x16xf32> to vector<48x16xf32>
    %cst_10 = arith.constant dense<0.000000e+00> : vector<256x16xf32>
    %16 = tpu.matmul %13, %15, %cst_10 {dimension_numbers = #tpu.dot_dimension_numbers<[1], [0], [0], [1], [0, 0, 1, 1], [], []>} : vector<256x48xf32>, vector<48x16xf32>, vector<256x16xf32> -> vector<256x16xf32>
    %17 = arith.addf %12, %16 : vector<256x16xf32>
    %18 = vector.extract_strided_slice %8 {offsets = [32, 0], sizes = [256, 48], strides = [1, 1]} : vector<288x48xf32> to vector<256x48xf32>
    %c0_11 = arith.constant 0 : index
    %c2 = arith.constant 2 : index
    %c0_12 = arith.constant 0 : index
    %c0_13 = arith.constant 0 : index
    %19 = vector.load %arg3[%c0_11, %c2, %c0_12, %c0_13] : memref<1x3x48x16xf32, #tpu.memory_space<vmem>>, vector<1x1x48x16xf32>
    %20 = vector.shape_cast %19 : vector<1x1x48x16xf32> to vector<48x16xf32>
    %cst_14 = arith.constant dense<0.000000e+00> : vector<256x16xf32>
    %21 = tpu.matmul %18, %20, %cst_14 {dimension_numbers = #tpu.dot_dimension_numbers<[1], [0], [0], [1], [0, 0, 1, 1], [], []>} : vector<256x48xf32>, vector<48x16xf32>, vector<256x16xf32> -> vector<256x16xf32>
    %22 = arith.addf %17, %21 : vector<256x16xf32>
    %c0_15 = arith.constant 0 : index
    %c0_16 = arith.constant 0 : index
    %c0_17 = arith.constant 0 : index
    %23 = vector.load %arg4[%c0_15, %c0_16, %c0_17] : memref<1x1x16xf32, #tpu.memory_space<vmem>>, vector<1x1x16xf32>
    %24 = vector.shape_cast %23 : vector<1x1x16xf32> to vector<1x16xf32>
    %25 = vector.broadcast %24 : vector<1x16xf32> to vector<256x16xf32>
    %26 = arith.addf %22, %25 : vector<256x16xf32>
    %27 = vector.shape_cast %26 : vector<256x16xf32> to vector<16x16x16xf32>
    %c4_i32 = arith.constant 4 : i32
    %c0_i32_18 = arith.constant 0 : i32
    %28 = arith.cmpi eq, %c4_i32, %c0_i32_18 : i32
    %c1_i32 = arith.constant 1 : i32
    %29 = arith.select %28, %c1_i32, %c4_i32 : i32
    %30 = arith.remsi %arg1, %29 : i32
    %c0_i32_19 = arith.constant 0 : i32
    %31 = arith.cmpi ne, %30, %c0_i32_19 : i32
    %c0_i32_20 = arith.constant 0 : i32
    %32 = arith.cmpi slt, %30, %c0_i32_20 : i32
    %c0_i32_21 = arith.constant 0 : i32
    %33 = arith.cmpi slt, %29, %c0_i32_21 : i32
    %34 = arith.xori %32, %33 : i1
    %35 = arith.andi %34, %31 : i1
    %36 = arith.addi %30, %29 : i32
    %37 = arith.select %35, %36, %30 : i32
    %c3_i32 = arith.constant 3 : i32
    %38 = arith.cmpi eq, %37, %c3_i32 : i32
    %true = arith.constant true
    %39 = arith.xori %38, %true : i1
    %40 = arith.extui %39 : i1 to i32
    %c0_i32_22 = arith.constant 0 : i32
    %41 = arith.cmpi ne, %40, %c0_i32_22 : i32
    scf.if %41 {
      %cst_25 = arith.constant 0.000000e+00 : f32
      %47 = vector.broadcast %cst_25 : f32 to vector<16x16x16xf32>
      %48 = arith.maximumf %27, %47 : vector<16x16x16xf32>
      %c1_26 = arith.constant 1 : index
      %c1_27 = arith.constant 1 : index
      %c0_28 = arith.constant 0 : index
      %49 = vector.load %arg6[%c1_26, %c1_27, %c0_28] : memref<18x18x16xf32, #tpu.memory_space<vmem>>, vector<16x16x16xf32>
      tpu.vector_store %arg6[%c1_26, %c1_27, %c0_28], %48 {strides = array<i32>} : memref<18x18x16xf32, #tpu.memory_space<vmem>>, vector<16x16x16xf32>,
    } else {
    }
    %42 = arith.extui %38 : i1 to i32
    %c0_i32_23 = arith.constant 0 : i32
    %43 = arith.cmpi ne, %42, %c0_i32_23 : i32
    scf.if %43 {
      %c0_25 = arith.constant 0 : index
      %c0_26 = arith.constant 0 : index
      %c0_27 = arith.constant 0 : index
      %47 = vector.load %arg7[%c0_25, %c0_26, %c0_27] : memref<16x16x16xf32, #tpu.memory_space<vmem>>, vector<16x16x16xf32>
      %48 = arith.subf %47, %27 : vector<16x16x16xf32>
      %c1_28 = arith.constant 1 : index
      %c1_29 = arith.constant 1 : index
      %c0_30 = arith.constant 0 : index
      %49 = vector.load %arg6[%c1_28, %c1_29, %c0_30] : memref<18x18x16xf32, #tpu.memory_space<vmem>>, vector<16x16x16xf32>
      tpu.vector_store %arg6[%c1_28, %c1_29, %c0_30], %48 {strides = array<i32>} : memref<18x18x16xf32, #tpu.memory_space<vmem>>, vector<16x16x16xf32>,
      %c0_31 = arith.constant 0 : index
      %c0_32 = arith.constant 0 : index
      %c0_33 = arith.constant 0 : index
      %50 = vector.load %arg7[%c0_31, %c0_32, %c0_33] : memref<16x16x16xf32, #tpu.memory_space<vmem>>, vector<16x16x16xf32>
      tpu.vector_store %arg7[%c0_31, %c0_32, %c0_33], %48 {strides = array<i32>} : memref<16x16x16xf32, #tpu.memory_space<vmem>>, vector<16x16x16xf32>,
    } else {
    }
    %c11_i32 = arith.constant 11 : i32
    %44 = arith.cmpi eq, %arg1, %c11_i32 : i32
    %45 = arith.extui %44 : i1 to i32
    %c0_i32_24 = arith.constant 0 : i32
    %46 = arith.cmpi ne, %45, %c0_i32_24 : i32
    scf.if %46 {
      %c0_25 = arith.constant 0 : index
      %c0_26 = arith.constant 0 : index
      %c0_27 = arith.constant 0 : index
      %47 = vector.load %arg7[%c0_25, %c0_26, %c0_27] : memref<16x16x16xf32, #tpu.memory_space<vmem>>, vector<16x16x16xf32>
      %c0_28 = arith.constant 0 : index
      %c0_29 = arith.constant 0 : index
      %c0_30 = arith.constant 0 : index
      %c0_31 = arith.constant 0 : index
      %48 = vector.load %arg5[%c0_28, %c0_29, %c0_30, %c0_31] : memref<1x16x16x16xf32, #tpu.memory_space<vmem>>, vector<1x16x16x16xf32>
      %49 = vector.shape_cast %48 : vector<1x16x16x16xf32> to vector<16x16x16xf32>
      %50 = vector.shape_cast %47 : vector<16x16x16xf32> to vector<1x16x16x16xf32>
      tpu.vector_store %arg5[%c0_28, %c0_29, %c0_30, %c0_31], %50 {strides = array<i32>} : memref<1x16x16x16xf32, #tpu.memory_space<vmem>>, vector<1x16x16x16xf32>,
    } else {
    }
    return
  }
  func.func @transform_0(%arg0: i32, %arg1: i32) -> (i32, i32, i32, i32) {
    %c0_i32 = arith.constant 0 : i32
    %c0_i32_0 = arith.constant 0 : i32
    %c0_i32_1 = arith.constant 0 : i32
    %c0_i32_2 = arith.constant 0 : i32
    return %arg0, %c0_i32, %c0_i32_0, %c0_i32_1 : i32, i32, i32, i32
  }
  func.func @transform_1(%arg0: i32, %arg1: i32) -> (i32, i32, i32, i32) {
    %c0_i32 = arith.constant 0 : i32
    %c0_i32_0 = arith.constant 0 : i32
    %c0_i32_1 = arith.constant 0 : i32
    %c0_i32_2 = arith.constant 0 : i32
    return %arg1, %c0_i32, %c0_i32_0, %c0_i32_1 : i32, i32, i32, i32
  }
  func.func @transform_2(%arg0: i32, %arg1: i32) -> (i32, i32, i32) {
    %c0_i32 = arith.constant 0 : i32
    %c0_i32_0 = arith.constant 0 : i32
    %c0_i32_1 = arith.constant 0 : i32
    return %arg1, %c0_i32, %c0_i32_0 : i32, i32, i32
  }
  func.func @transform_3(%arg0: i32, %arg1: i32) -> (i32, i32, i32, i32) {
    %c0_i32 = arith.constant 0 : i32
    %c0_i32_0 = arith.constant 0 : i32
    %c0_i32_1 = arith.constant 0 : i32
    %c0_i32_2 = arith.constant 0 : i32
    return %arg0, %c0_i32, %c0_i32_0, %c0_i32_1 : i32, i32, i32, i32
  }
}

</mosaic_0001>

<bundles_post_ra>
// kernel: dncnn_multiblock_forward.1
= control target key start
LH: loop header
LB: loop body
LE: loop exit
PB: predicated region body
PF: predicated region fallthrough
CT: control target
= control target key end

     0   :  { %s2114_s12 = smov 0   ;;  %s2116_s13 = smov 0   ;;  %s3315_s0 = inlined_call_operand.vmem [shape: f32[2,16,16,16], index: 0, kind: input, shape index: {}, may-alias: {0,3}]   ;;  %s3316_s1 = inlined_call_operand.vmem [shape: f32[12,3,48,16], index: 1, kind: input, shape index: {}]   ;;  %s3317_s2 = inlined_call_operand.vmem [shape: f32[12,1,16], index: 2, kind: input, shape index: {}]   ;;  %s3318_s3 = inlined_call_operand.vmem [shape: f32[2,16,16,16], index: 3, kind: output, shape index: {}, may-alias: {0,3}]  }
   0x1   :  { %s2118_s14 = smov 0   ;;  %s2120_s15 = smov 0  }
   0x2   :  { %s2122_s16 = smov 0  }
   0x3 LB: > { %s22_s17 = sadd.s32 1, %s2081_s14  ;;  %s25_s18 = sadd.s32 1, %s2085_s15  ;;  %s2089_s16 = sphi %s2122_s16, %s13_s16   ;;  %s2085_s15 = sphi %s2120_s15, %s3322_s15   ;;  %s2081_s14 = sphi %s2118_s14, %s3321_s14   ;;  %s2077_s13 = sphi %s2116_s13, %s3320_s13   ;;  %s2073_s12 = sphi %s2114_s12, %s3319_s12  }
   0x4   : > { %p23_p0 = scmp.ge.s32.totalorder %s22_s17, 12  ;;  %p1863_p1 = scmp.ge.s32.totalorder %s2089_s16, 1 }
   0x5   : > { %p167_p2 = scmp.lt.s32.totalorder %s2089_s16, 25 }
   0x6   : > { %s3324_s17 = smov (%p23_p0, %s22_s17), 0  ;;  %s3326_s18 = smov (!%p23_p0, %s25_s18), %s2085_s15 }
   0x7   : > { %p168_p3 = pnand %p1863_p1, %p167_p2  ;;  %p27_p4 = scmp.ge.s32.totalorder %s3326_s18, 2 }
   0x8   : > { %p199_p5 = scmp.lt.s32.totalorder (!%p168_p3), %s2077_s13, 1  ;;  %p204_p6 = scmp.lt.s32.totalorder (!%p168_p3), %s2073_s12, 11 }
   0x9   : > { %s3328_s18 = smov (%p27_p4, %s3326_s18), 0  ;;  %171 = sbr.rel (%p168_p3) target bundleno = 777 (0x309), region = 32 }
   0xa   : > { %p1869_p7 = scmp.ne.s32.totalorder (!%p168_p3), %s2073_s12, 0 }
   0xe   : > { %s3330_s13 = smov (!%p199_p5, %s2077_s13), 1 }
   0xf   : > { %s2148_s19 = scalar_select %p204_p6, %s2073_s12, 11 }
  0x10   : > { %s1986_s20 = sshll.u32 %s3330_s13, 8  ;;  %220 = sbr.rel (%p1869_p7) target bundleno = 140 (0x8c), region = 36 }
  0x11   : > { %s2153_s23 = scalar_lea.vmem %s3315_s0, %s1986_s20  ;;  %s2006_s24 = smul.u32 144, %s2148_s19 }
  0x12   : > { %s211_s27 = scalar_lea.vmem %s3317_s2, %s2148_s19  ;;  %s2163_s30 = scalar_lea.vmem %s3318_s3, %s1986_s20 }
  0x13   : > { %s2168_s6 = scalar_lea.vmem %s3316_s1, %s2006_s24 }
  0x15   : > { %vm221_vm0 = vcmask 130048   ;;  %v2091_v0 = vmov 0.0   ;;  %vm224_vm1 = vcmask 123904   ;;  %v277_v1 = vld [vmem:[%s2153_s23] sm:$0xff]  ;;  %v278_v2 = vld [vmem:[%s2153_s23 + $0x8] sm:$0xff]  ;;  %v279_v3 = vld [vmem:[%s2153_s23 + $0x10] sm:$0xff] }
  0x16   : > { %226 = vst.msk [vmem:[#allocation2 + $0x18] sm:$0xff] %vm221_vm0, %v2091_v0  ;;  %v280_v4 = vld [vmem:[%s2153_s23 + $0x18] sm:$0xff]  ;;  %v281_v5 = vld [vmem:[%s2153_s23 + $0x20] sm:$0xff]  ;;  %v282_v6 = vld [vmem:[%s2153_s23 + $0x28] sm:$0xff] }
  0x17   : > { %222 = vst.msk [vmem:[#allocation2] sm:$0xff] %vm221_vm0, %v2091_v0  ;;  %v283_v7 = vld [vmem:[%s2153_s23 + $0x30] sm:$0xff]  ;;  %v284_v8 = vld [vmem:[%s2153_s23 + $0x38] sm:$0xff]  ;;  %v285_v9 = vld [vmem:[%s2153_s23 + $0x40] sm:$0xff] }
  0x18   : > { %223 = vst.msk [vmem:[#allocation2 + $0x8] sm:$0xff] %vm221_vm0, %v2091_v0  ;;  %v286_v10 = vld [vmem:[%s2153_s23 + $0x48] sm:$0xff]  ;;  %v287_v11 = vld [vmem:[%s2153_s23 + $0x50] sm:$0xff]  ;;  %v288_v12 = vld [vmem:[%s2153_s23 + $0x58] sm:$0xff] }
  0x19   : > { %227 = vst.msk [vmem:[#allocation2 + $0x20] sm:$0xff] %vm221_vm0, %v2091_v0  ;;  %v289_v13 = vld [vmem:[%s2153_s23 + $0x60] sm:$0xff]  ;;  %v290_v14 = vld [vmem:[%s2153_s23 + $0x68] sm:$0xff]  ;;  %v291_v15 = vld [vmem:[%s2153_s23 + $0x70] sm:$0xff] }
  0x1a   : > { %229 = vst.msk [vmem:[#allocation2 + $0x30] sm:$0xff] %vm221_vm0, %v2091_v0  ;;  %v292_v16 = vld [vmem:[%s2153_s23 + $0x78] sm:$0xff]  ;;  %v293_v17 = vld [vmem:[%s2153_s23 + $0x80] sm:$0xff]  ;;  %v294_v18 = vld [vmem:[%s2153_s23 + $0x88] sm:$0xff] }
  0x1b   : > { %230 = vst.msk [vmem:[#allocation2 + $0x38] sm:$0xff] %vm221_vm0, %v2091_v0  ;;  %v295_v19 = vld [vmem:[%s2153_s23 + $0x90] sm:$0xff]  ;;  %v296_v20 = vld [vmem:[%s2153_s23 + $0x98] sm:$0xff]  ;;  %v297_v21 = vld [vmem:[%s2153_s23 + $0xa0] sm:$0xff] }
  0x1c   : > { %232 = vst.msk [vmem:[#allocation2 + $0x48] sm:$0xff] %vm221_vm0, %v2091_v0  ;;  %v298_v22 = vld [vmem:[%s2153_s23 + $0xa8] sm:$0xff]  ;;  %v299_v23 = vld [vmem:[%s2153_s23 + $0xb0] sm:$0xff]  ;;  %v300_v24 = vld [vmem:[%s2153_s23 + $0xb8] sm:$0xff] }
  0x1d   : > { %233 = vst.msk [vmem:[#allocation2 + $0x50] sm:$0xff] %vm221_vm0, %v2091_v0  ;;  %v301_v25 = vld [vmem:[%s2153_s23 + $0xc0] sm:$0xff]  ;;  %v302_v26 = vld [vmem:[%s2153_s23 + $0xc8] sm:$0xff]  ;;  %v303_v27 = vld [vmem:[%s2153_s23 + $0xd0] sm:$0xff] }
  0x1e   : > { %235 = vst.msk [vmem:[#allocation2 + $0x60] sm:$0xff] %vm221_vm0, %v2091_v0  ;;  %v304_v28 = vld [vmem:[%s2153_s23 + $0xd8] sm:$0xff]  ;;  %v305_v29 = vld [vmem:[%s2153_s23 + $0xe0] sm:$0xff]  ;;  %v306_v30 = vld [vmem:[%s2153_s23 + $0xe8] sm:$0xff] }
  0x1f   : > { %236 = vst.msk [vmem:[#allocation2 + $0x68] sm:$0xff] %vm221_vm0, %v2091_v0  ;;  %v307_v31 = vld [vmem:[%s2153_s23 + $0xf0] sm:$0xff]  ;;  %v308_v32 = vld [vmem:[%s2153_s23 + $0xf8] sm:$0xff] }
  0x20   : > { %238 = vst.msk [vmem:[#allocation2 + $0x78] sm:$0xff] %vm221_vm0, %v2091_v0 }
  0x21   : > { %239 = vst.msk [vmem:[#allocation2 + $0x80] sm:$0xff] %vm221_vm0, %v2091_v0 }
  0x22   : > { %241 = vst.msk [vmem:[#allocation2 + $0x90] sm:$0xff] %vm221_vm0, %v2091_v0 }
  0x23   : > { %242 = vst.msk [vmem:[#allocation2 + $0x98] sm:$0xff] %vm221_vm0, %v2091_v0 }
  0x24   : > { %244 = vst.msk [vmem:[#allocation2 + $0xa8] sm:$0xff] %vm221_vm0, %v2091_v0 }
  0x25   : > { %245 = vst.msk [vmem:[#allocation2 + $0xb0] sm:$0xff] %vm221_vm0, %v2091_v0 }
  0x26   : > { %247 = vst.msk [vmem:[#allocation2 + $0xc0] sm:$0xff] %vm221_vm0, %v2091_v0 }
  0x27   : > { %248 = vst.msk [vmem:[#allocation2 + $0xc8] sm:$0xff] %vm221_vm0, %v2091_v0 }
  0x28   : > { %250 = vst.msk [vmem:[#allocation2 + $0xd8] sm:$0xff] %vm221_vm0, %v2091_v0 }
  0x29   : > { %251 = vst.msk [vmem:[#allocation2 + $0xe0] sm:$0xff] %vm221_vm0, %v2091_v0 }
  0x2a   : > { %253 = vst.msk [vmem:[#allocation2 + $0xf0] sm:$0xff] %vm221_vm0, %v2091_v0 }
  0x2b   : > { %254 = vst.msk [vmem:[#allocation2 + $0xf8] sm:$0xff] %vm221_vm0, %v2091_v0 }
  0x2c   : > { %256 = vst.msk [vmem:[#allocation2 + $0x108] sm:$0xff] %vm221_vm0, %v2091_v0 }
  0x2d   : > { %257 = vst.msk [vmem:[#allocation2 + $0x110] sm:$0xff] %vm221_vm0, %v2091_v0 }
  0x2e   : > { %259 = vst.msk [vmem:[#allocation2 + $0x120] sm:$0xff] %vm221_vm0, %v2091_v0 }
  0x2f   : > { %260 = vst.msk [vmem:[#allocation2 + $0x128] sm:$0xff] %vm221_vm0, %v2091_v0 }
  0x30   : > { %262 = vst.msk [vmem:[#allocation2 + $0x138] sm:$0xff] %vm221_vm0, %v2091_v0 }
  0x31   : > { %263 = vst.msk [vmem:[#allocation2 + $0x140] sm:$0xff] %vm221_vm0, %v2091_v0 }
  0x32   : > { %265 = vst.msk [vmem:[#allocation2 + $0x150] sm:$0xff] %vm221_vm0, %v2091_v0 }
  0x33   : > { %266 = vst.msk [vmem:[#allocation2 + $0x158] sm:$0xff] %vm221_vm0, %v2091_v0 }
  0x34   : > { %268 = vst.msk [vmem:[#allocation2 + $0x168] sm:$0xff] %vm221_vm0, %v2091_v0 }
  0x35   : > { %269 = vst.msk [vmem:[#allocation2 + $0x170] sm:$0xff] %vm221_vm0, %v2091_v0 }
  0x36   : > { %271 = vst.msk [vmem:[#allocation2 + $0x180] sm:$0xff] %vm221_vm0, %v2091_v0 }
  0x37   : > { %272 = vst.msk [vmem:[#allocation2 + $0x188] sm:$0xff] %vm221_vm0, %v2091_v0 }
  0x38   : > { %274 = vst.msk [vmem:[#allocation2 + $0x198] sm:$0xff] %vm221_vm0, %v2091_v0 }
  0x39   : > { %275 = vst.msk [vmem:[#allocation2 + $0x1a0] sm:$0xff] %vm221_vm0, %v2091_v0 }
  0x3a   : > { %228 = vst.msk [vmem:[#allocation2 + $0x28] sm:$0x3] %vm224_vm1, %v2091_v0 }
  0x3b   : > { %225 = vst.msk [vmem:[#allocation2 + $0x10] sm:$0x3] %vm224_vm1, %v2091_v0 }
  0x3c   : > { %231 = vst.msk [vmem:[#allocation2 + $0x40] sm:$0x3] %vm224_vm1, %v2091_v0 }
  0x3d   : > { %234 = vst.msk [vmem:[#allocation2 + $0x58] sm:$0x3] %vm224_vm1, %v2091_v0 }
  0x3e   : > { %237 = vst.msk [vmem:[#allocation2 + $0x70] sm:$0x3] %vm224_vm1, %v2091_v0 }
  0x3f   : > { %240 = vst.msk [vmem:[#allocation2 + $0x88] sm:$0x3] %vm224_vm1, %v2091_v0 }
  0x40   : > { %243 = vst.msk [vmem:[#allocation2 + $0xa0] sm:$0x3] %vm224_vm1, %v2091_v0 }
  0x41   : > { %246 = vst.msk [vmem:[#allocation2 + $0xb8] sm:$0x3] %vm224_vm1, %v2091_v0 }
  0x42   : > { %249 = vst.msk [vmem:[#allocation2 + $0xd0] sm:$0x3] %vm224_vm1, %v2091_v0 }
  0x43   : > { %252 = vst.msk [vmem:[#allocation2 + $0xe8] sm:$0x3] %vm224_vm1, %v2091_v0 }
  0x44   : > { %255 = vst.msk [vmem:[#allocation2 + $0x100] sm:$0x3] %vm224_vm1, %v2091_v0 }
  0x45   : > { %258 = vst.msk [vmem:[#allocation2 + $0x118] sm:$0x3] %vm224_vm1, %v2091_v0 }
  0x46   : > { %261 = vst.msk [vmem:[#allocation2 + $0x130] sm:$0x3] %vm224_vm1, %v2091_v0 }
  0x47   : > { %264 = vst.msk [vmem:[#allocation2 + $0x148] sm:$0x3] %vm224_vm1, %v2091_v0 }
  0x48   : > { %267 = vst.msk [vmem:[#allocation2 + $0x160] sm:$0x3] %vm224_vm1, %v2091_v0 }
  0x49   : > { %270 = vst.msk [vmem:[#allocation2 + $0x178] sm:$0x3] %vm224_vm1, %v2091_v0 }
  0x4a   : > { %273 = vst.msk [vmem:[#allocation2 + $0x190] sm:$0x3] %vm224_vm1, %v2091_v0 }
  0x4b   : > { %276 = vst.msk [vmem:[#allocation2 + $0x1a8] sm:$0x3] %vm224_vm1, %v2091_v0 }
  0x4c   : > { %310 = vst.msk [vmem:[#allocation2 + $0x19] sm:$0xff] %vm221_vm0, %v277_v1 }
  0x4d   : > { %342 = vst.msk [vmem:[#allocation3] sm:$0xff] %vm221_vm0, %v277_v1 }
  0x4e   : > { %311 = vst.msk [vmem:[#allocation2 + $0x21] sm:$0xff] %vm221_vm0, %v278_v2 }
  0x4f   : > { %343 = vst.msk [vmem:[#allocation3 + $0x8] sm:$0xff] %vm221_vm0, %v278_v2 }
  0x50   : > { %312 = vst.msk [vmem:[#allocation2 + $0x31] sm:$0xff] %vm221_vm0, %v279_v3 }
  0x51   : > { %344 = vst.msk [vmem:[#allocation3 + $0x10] sm:$0xff] %vm221_vm0, %v279_v3 }
  0x52   : > { %313 = vst.msk [vmem:[#allocation2 + $0x39] sm:$0xff] %vm221_vm0, %v280_v4 }
  0x53   : > { %345 = vst.msk [vmem:[#allocation3 + $0x18] sm:$0xff] %vm221_vm0, %v280_v4 }
  0x54   : > { %314 = vst.msk [vmem:[#allocation2 + $0x49] sm:$0xff] %vm221_vm0, %v281_v5 }
  0x55   : > { %346 = vst.msk [vmem:[#allocation3 + $0x20] sm:$0xff] %vm221_vm0, %v281_v5 }
  0x56   : > { %315 = vst.msk [vmem:[#allocation2 + $0x51] sm:$0xff] %vm221_vm0, %v282_v6 }
  0x57   : > { %347 = vst.msk [vmem:[#allocation3 + $0x28] sm:$0xff] %vm221_vm0, %v282_v6 }
  0x58   : > { %316 = vst.msk [vmem:[#allocation2 + $0x61] sm:$0xff] %vm221_vm0, %v283_v7 }
  0x59   : > { %348 = vst.msk [vmem:[#allocation3 + $0x30] sm:$0xff] %vm221_vm0, %v283_v7 }
  0x5a   : > { %317 = vst.msk [vmem:[#allocation2 + $0x69] sm:$0xff] %vm221_vm0, %v284_v8 }
  0x5b   : > { %349 = vst.msk [vmem:[#allocation3 + $0x38] sm:$0xff] %vm221_vm0, %v284_v8 }
  0x5c   : > { %318 = vst.msk [vmem:[#allocation2 + $0x79] sm:$0xff] %vm221_vm0, %v285_v9 }
  0x5d   : > { %350 = vst.msk [vmem:[#allocation3 + $0x40] sm:$0xff] %vm221_vm0, %v285_v9 }
  0x5e   : > { %319 = vst.msk [vmem:[#allocation2 + $0x81] sm:$0xff] %vm221_vm0, %v286_v10 }
  0x5f   : > { %351 = vst.msk [vmem:[#allocation3 + $0x48] sm:$0xff] %vm221_vm0, %v286_v10 }
  0x60   : > { %320 = vst.msk [vmem:[#allocation2 + $0x91] sm:$0xff] %vm221_vm0, %v287_v11 }
  0x61   : > { %352 = vst.msk [vmem:[#allocation3 + $0x50] sm:$0xff] %vm221_vm0, %v287_v11 }
  0x62   : > { %321 = vst.msk [vmem:[#allocation2 + $0x99] sm:$0xff] %vm221_vm0, %v288_v12 }
  0x63   : > { %353 = vst.msk [vmem:[#allocation3 + $0x58] sm:$0xff] %vm221_vm0, %v288_v12 }
  0x64   : > { %322 = vst.msk [vmem:[#allocation2 + $0xa9] sm:$0xff] %vm221_vm0, %v289_v13 }
  0x65   : > { %354 = vst.msk [vmem:[#allocation3 + $0x60] sm:$0xff] %vm221_vm0, %v289_v13 }
  0x66   : > { %323 = vst.msk [vmem:[#allocation2 + $0xb1] sm:$0xff] %vm221_vm0, %v290_v14 }
  0x67   : > { %355 = vst.msk [vmem:[#allocation3 + $0x68] sm:$0xff] %vm221_vm0, %v290_v14 }
  0x68   : > { %324 = vst.msk [vmem:[#allocation2 + $0xc1] sm:$0xff] %vm221_vm0, %v291_v15 }
  0x69   : > { %356 = vst.msk [vmem:[#allocation3 + $0x70] sm:$0xff] %vm221_vm0, %v291_v15 }
  0x6a   : > { %325 = vst.msk [vmem:[#allocation2 + $0xc9] sm:$0xff] %vm221_vm0, %v292_v16 }
  0x6b   : > { %357 = vst.msk [vmem:[#allocation3 + $0x78] sm:$0xff] %vm221_vm0, %v292_v16 }
  0x6c   : > { %326 = vst.msk [vmem:[#allocation2 + $0xd9] sm:$0xff] %vm221_vm0, %v293_v17 }
  0x6d   : > { %358 = vst.msk [vmem:[#allocation3 + $0x80] sm:$0xff] %vm221_vm0, %v293_v17 }
  0x6e   : > { %327 = vst.msk [vmem:[#allocation2 + $0xe1] sm:$0xff] %vm221_vm0, %v294_v18 }
  0x6f   : > { %359 = vst.msk [vmem:[#allocation3 + $0x88] sm:$0xff] %vm221_vm0, %v294_v18 }
  0x70   : > { %328 = vst.msk [vmem:[#allocation2 + $0xf1] sm:$0xff] %vm221_vm0, %v295_v19 }
  0x71   : > { %360 = vst.msk [vmem:[#allocation3 + $0x90] sm:$0xff] %vm221_vm0, %v295_v19 }
  0x72   : > { %329 = vst.msk [vmem:[#allocation2 + $0xf9] sm:$0xff] %vm221_vm0, %v296_v20 }
  0x73   : > { %361 = vst.msk [vmem:[#allocation3 + $0x98] sm:$0xff] %vm221_vm0, %v296_v20 }
  0x74   : > { %330 = vst.msk [vmem:[#allocation2 + $0x109] sm:$0xff] %vm221_vm0, %v297_v21 }
  0x75   : > { %362 = vst.msk [vmem:[#allocation3 + $0xa0] sm:$0xff] %vm221_vm0, %v297_v21 }
  0x76   : > { %331 = vst.msk [vmem:[#allocation2 + $0x111] sm:$0xff] %vm221_vm0, %v298_v22 }
  0x77   : > { %363 = vst.msk [vmem:[#allocation3 + $0xa8] sm:$0xff] %vm221_vm0, %v298_v22 }
  0x78   : > { %332 = vst.msk [vmem:[#allocation2 + $0x121] sm:$0xff] %vm221_vm0, %v299_v23 }
  0x79   : > { %364 = vst.msk [vmem:[#allocation3 + $0xb0] sm:$0xff] %vm221_vm0, %v299_v23 }
  0x7a   : > { %333 = vst.msk [vmem:[#allocation2 + $0x129] sm:$0xff] %vm221_vm0, %v300_v24 }
  0x7b   : > { %365 = vst.msk [vmem:[#allocation3 + $0xb8] sm:$0xff] %vm221_vm0, %v300_v24 }
  0x7c   : > { %334 = vst.msk [vmem:[#allocation2 + $0x139] sm:$0xff] %vm221_vm0, %v301_v25 }
  0x7d   : > { %366 = vst.msk [vmem:[#allocation3 + $0xc0] sm:$0xff] %vm221_vm0, %v301_v25 }
  0x7e   : > { %335 = vst.msk [vmem:[#allocation2 + $0x141] sm:$0xff] %vm221_vm0, %v302_v26 }
  0x7f   : > { %367 = vst.msk [vmem:[#allocation3 + $0xc8] sm:$0xff] %vm221_vm0, %v302_v26 }
  0x80   : > { %336 = vst.msk [vmem:[#allocation2 + $0x151] sm:$0xff] %vm221_vm0, %v303_v27 }
  0x81   : > { %368 = vst.msk [vmem:[#allocation3 + $0xd0] sm:$0xff] %vm221_vm0, %v303_v27 }
  0x82   : > { %337 = vst.msk [vmem:[#allocation2 + $0x159] sm:$0xff] %vm221_vm0, %v304_v28 }
  0x83   : > { %369 = vst.msk [vmem:[#allocation3 + $0xd8] sm:$0xff] %vm221_vm0, %v304_v28 }
  0x84   : > { %338 = vst.msk [vmem:[#allocation2 + $0x169] sm:$0xff] %vm221_vm0, %v305_v29 }
  0x85   : > { %370 = vst.msk [vmem:[#allocation3 + $0xe0] sm:$0xff] %vm221_vm0, %v305_v29 }
  0x86   : > { %339 = vst.msk [vmem:[#allocation2 + $0x171] sm:$0xff] %vm221_vm0, %v306_v30 }
  0x87   : > { %371 = vst.msk [vmem:[#allocation3 + $0xe8] sm:$0xff] %vm221_vm0, %v306_v30 }
  0x88   : > { %340 = vst.msk [vmem:[#allocation2 + $0x181] sm:$0xff] %vm221_vm0, %v307_v31 }
  0x89   : > { %372 = vst.msk [vmem:[#allocation3 + $0xf0] sm:$0xff] %vm221_vm0, %v307_v31 }
  0x8a   : > { %341 = vst.msk [vmem:[#allocation2 + $0x189] sm:$0xff] %vm221_vm0, %v308_v32 }
  0x8b   : > { %373 = vst.msk [vmem:[#allocation3 + $0xf8] sm:$0xff] %vm221_vm0, %v308_v32 }
  0x8c PF: > { %v2321_v33 = vld [vmem:[#allocation2 + $0x30] sm:$0xff]  ;;  %v2323_v34 = vld [vmem:[#allocation2 + $0x38] sm:$0xff]  ;;  %vm681_vm2 = vcmask 1045504   ;;  %vm482_vm3 = vcmask 1046528   ;;  %v2331_v40 = vld [vmem:[#allocation2 + $0x140] sm:$0xff]  ;;  %s2092_s7 = smov 32  }
  0x8d   : > { %v692_v35 = vrot.slane %v2321_v33, 2  ;;  %v693_v36 = vrot.slane %v2323_v34, 2  ;;  %v493_v37 = vrot.slane %v2321_v33, 1  ;;  %v494_v38 = vrot.slane %v2323_v34, 1  ;;  %v2329_v39 = vld [vmem:[#allocation2 + $0x138] sm:$0xff]  ;;  %s2093_s8 = smov 16  }
  0x8e   : > { %v747_v43 = vrot.slane %v2329_v39, 2  ;;  %v2338_v44 = vld [vmem:[#allocation2] sm:$0xff]  ;;  %v748_v45 = vrot.slane %v2331_v40, 2  ;;  %v548_v46 = vrot.slane %v2329_v39, 1  ;;  %v549_v47 = vrot.slane %v2331_v40, 1  ;;  %v2343_v48 = vld [vmem:[#allocation2 + $0x8] sm:$0xff] }
  0x8f   : > { %v694_v41 = vsel %vm681_vm2, %v692_v35, %v693_v36  ;;  %v495_v42 = vsel %vm482_vm3, %v493_v37, %v494_v38  ;;  %v483_v49 = vrot.slane %v2338_v44, 1  ;;  %v484_v50 = vrot.slane %v2343_v48, 1  ;;  %v2350_v54 = vld [vmem:[#allocation2 + $0x18] sm:$0xff]  ;;  %v2352_v55 = vld [vmem:[#allocation2 + $0x20] sm:$0xff]  ;;  %v415_v2 = vld [vmem:[#allocation2 + $0x148] sm:$0x3] }
  0x90   : > { %780 = vrot.lane.b32.xlu1 %v694_v41, %s2092_s7  ;;  %581 = vrot.lane.b32.xlu0 %v495_v42, %s2093_s8  ;;  %v749_v52 = vsel %vm681_vm2, %v747_v43, %v748_v45  ;;  %v550_v53 = vsel %vm482_vm3, %v548_v46, %v549_v47  ;;  %v489_v56 = vrot.slane %v2352_v55, 1  ;;  %v488_v57 = vrot.slane %v2350_v54, 1  ;;  %v382_v1 = vld [vmem:[#allocation2 + $0x40] sm:$0x3]  ;;  %v379_v9 = vld [vmem:[#allocation2 + $0x28] sm:$0x3] }
  0x91   : > { %v485_v51 = vsel %vm482_vm3, %v483_v49, %v484_v50  ;;  %v687_v58 = vrot.slane %v2350_v54, 2  ;;  %v688_v59 = vrot.slane %v2352_v55, 2  ;;  %v682_v60 = vrot.slane %v2338_v44, 2  ;;  %v376_v10 = vld [vmem:[#allocation2 + $0x10] sm:$0x3]  ;;  %v2379_v17 = vld [vmem:[#allocation2 + $0x48] sm:$0xff] }
  0x92   : > { %573 = vrot.lane.b32.xlu2 %v485_v51, %s2093_s8  ;;  %v683_v61 = vrot.slane %v2343_v48, 2  ;;  %v490_v62 = vsel %vm482_vm3, %v488_v57, %v489_v56  ;;  %v496_v3 = vrot.slane %v382_v1, 1  ;;  %v695_v4 = vrot.slane %v382_v1, 2  ;;  %v2381_v18 = vld [vmem:[#allocation2 + $0x50] sm:$0xff]  ;;  %v2393_v27 = vld [vmem:[#allocation2 + $0x158] sm:$0xff]  ;;  %v2412_v51 = vld [vmem:[#allocation2 + $0x168] sm:$0xff] }
  0x93   : > { %v689_v63 = vsel %vm681_vm2, %v687_v58, %v688_v59  ;;  %v551_v5 = vrot.slane %v415_v2, 1  ;;  %v750_v11 = vrot.slane %v415_v2, 2  ;;  %v491_v12 = vrot.slane %v379_v9, 1  ;;  %v2390_v26 = vld [vmem:[#allocation2 + $0x150] sm:$0xff]  ;;  %v385_v41 = vld [vmem:[#allocation2 + $0x58] sm:$0x3] }
  0x94   : > { %v684_v0 = vsel %vm681_vm2, %v682_v60, %v683_v61  ;;  %v497_v6 = vsel %vm482_vm3, %v494_v38, %v496_v3  ;;  %v696_v7 = vsel %vm681_vm2, %v693_v36, %v695_v4  ;;  %v486_v13 = vrot.slane %v376_v10, 1  ;;  %v418_v42 = vld [vmem:[#allocation2 + $0x160] sm:$0x3]  ;;  %v388_v1 = vld [vmem:[#allocation2 + $0x70] sm:$0x3]  ;;  %s1491_s11 = ssub.s32 0, %s2073_s12 }
  0x95   : > { %v552_v8 = vsel %vm482_vm3, %v549_v47, %v551_v5  ;;  %v751_v14 = vsel %vm681_vm2, %v748_v45, %v750_v11  ;;  %v492_v15 = vsel %vm482_vm3, %v489_v56, %v491_v12  ;;  %v685_v19 = vrot.slane %v376_v10, 2  ;;  %v2419_v56 = vld [vmem:[#allocation2 + $0x68] sm:$0xff]  ;;  %v421_v10 = vld [vmem:[#allocation2 + $0x178] sm:$0x3]  ;;  %s1978_s13 = smin.u32 %s2073_s12, %s1491_s11  ;;  %p1490_p8 = scmp.lt.s32.totalorder %s2073_s12, 0 }
  0x96   : > { %v487_v16 = vsel %vm482_vm3, %v484_v50, %v486_v13  ;;  %v498_v20 = vrot.slane %v2379_v17, 1  ;;  %v499_v21 = vrot.slane %v2381_v18, 1  ;;  %v690_v22 = vrot.slane %v379_v9, 2  ;;  %v2444_v12 = vld [vmem:[%s2168_s6 + $0x88] sm:$0xff]  ;;  %v2447_v13 = vld [vmem:[%s2168_s6 + $0x80] sm:$0xff]  ;;  %s1493_s19 = sand.u32 3, %s1978_s13  }
  0x97   : > { %v686_v23 = vsel %vm681_vm2, %v683_v61, %v685_v19  ;;  %v553_v28 = vrot.slane %v2390_v26, 1  ;;  %v554_v29 = vrot.slane %v2393_v27, 1  ;;  %v752_v30 = vrot.slane %v2390_v26, 2  ;;  %1319 = vmatpush.msra.mxu2 %v2444_v12  ;;  %v2452_v19 = vld [vmem:[%s2168_s6 + $0x78] sm:$0xff]  ;;  %s1494_s20 = ssub.s32 0, %s1493_s19 }
  0x98   : > { %824 = vrot.lane.b32.xlu1 %v749_v52, %s2092_s7  ;;  %625 = vrot.lane.b32.xlu0 %v550_v53, %s2093_s8  ;;  %v500_v24 = vsel %vm482_vm3, %v498_v20, %v499_v21  ;;  %v691_v25 = vsel %vm681_vm2, %v688_v59, %v690_v22  ;;  %v753_v31 = vrot.slane %v2393_v27, 2  ;;  %v697_v32 = vrot.slane %v2379_v17, 2  ;;  %v2415_v52 = vld [vmem:[#allocation2 + $0x170] sm:$0xff]  ;;  %v2417_v53 = vld [vmem:[#allocation2 + $0x60] sm:$0xff]  ;;  %s3332_s20 = smov (!%p1490_p8, %s1494_s20), %s1493_s19 }
  0x99   : > { %v698_v35 = vrot.slane %v2381_v18, 2  ;;  %v555_v36 = vsel %vm482_vm3, %v553_v28, %v554_v29  ;;  %v501_v43 = vrot.slane %v385_v41, 1  ;;  %v700_v45 = vrot.slane %v385_v41, 2  ;;  %1320 = vmatpush.msra.mxu2 %v2447_v13  ;;  %v2456_v20 = vld [vmem:[%s2168_s6 + $0x70] sm:$0xff]  ;;  %v2468_v28 = vld [vmem:[#allocation2 + $0x188] sm:$0xff]  ;;  %p1980_p9 = scmp.lt.s32.totalorder %s3332_s20, 0 }
  0x9a   : > { %577 = vrot.lane.b32.xlu2 %v490_v62, %s2093_s8  ;;  %v754_v37 = vsel %vm681_vm2, %v752_v30, %v753_v31  ;;  %v556_v46 = vrot.slane %v418_v42, 1  ;;  %v755_v57 = vrot.slane %v418_v42, 2  ;;  %v558_v58 = vrot.slane %v2412_v51, 1  ;;  %v1874_v42 = vld [vmem:[%s2168_s6 + $0x50] sm:$0xff]  ;;  %s1500_s21 = sadd.s32 4, %s3332_s20 }
  0x9b   : > { %v699_v38 = vsel %vm681_vm2, %v697_v32, %v698_v35  ;;  %v502_v47 = vsel %vm482_vm3, %v499_v21, %v501_v43  ;;  %v701_v49 = vsel %vm681_vm2, %v698_v35, %v700_v45  ;;  %v559_v59 = vrot.slane %v2415_v52, 1  ;;  %1321 = vmatpush.msra.mxu2 %v2452_v19  ;;  %v2477_v32 = vld [vmem:[%s2168_s6 + $0x68] sm:$0xff]  ;;  %v2487_v43 = vld [vmem:[%s2168_s6 + $0x60] sm:$0xff]  ;;  %s3334_s21 = smov (!%p1980_p9, %s1500_s21), %s3332_s20 }
  0x9c   : > { %v557_v50 = vsel %vm482_vm3, %v554_v29, %v556_v46  ;;  %v503_v60 = vrot.slane %v2417_v53, 1  ;;  %v504_v61 = vrot.slane %v2419_v56, 1  ;;  %v756_v62 = vsel %vm681_vm2, %v753_v31, %v755_v57  ;;  %v1875_v31 = vld [vmem:[%s2168_s6 + $0x58] sm:$0xff]  ;;  %p1981_p10 = scmp.eq.s32.totalorder %s3334_s21, 3 }
  0x9d   : > { %v702_v2 = vrot.slane %v2417_v53, 2  ;;  %v703_v3 = vrot.slane %v2419_v56, 2  ;;  %v506_v4 = vrot.slane %v388_v1, 1  ;;  %v757_v5 = vrot.slane %v2412_v51, 2  ;;  %1322 = vmatpush.msra.mxu2 %v2456_v20  ;;  %1988 = vmatpush.msra.mxu3 %v1875_v31 }
  0x9e   : > { %v561_v11 = vrot.slane %v421_v10, 1  ;;  %1074 = vmatpush.msra.mxu0 %v1875_v31  ;;  %v2524_v31 = vld [vmem:[#allocation2 + $0x120] sm:$0xff]  ;;  %vm880_vm4 = vcmask 130048   ;;  %vm917_vm5 = vcmask 261120   ;;  %vm967_vm6 = vcmask 392192  }
  0x9f   : > { %1323 = vmatpush.msra.mxu2 %v2477_v32  ;;  %1989 = vmatpush.msra.mxu3 %v1874_v42 }
  0xa0   : > { %776 = vrot.lane.b32.xlu1 %v689_v63, %s2092_s7  ;;  %772 = vrot.lane.b32.xlu0 %v684_v0, %s2092_s7  ;;  %v560_v63 = vsel %vm482_vm3, %v558_v58, %v559_v59  ;;  %v505_v0 = vsel %vm482_vm3, %v503_v60, %v504_v61  ;;  %v1872_v58 = vld [vmem:[%s2168_s6 + $0x40] sm:$0xff]  ;;  %v959_v60 = vld [vmem:[%s2168_s6 + $0x28] sm:$0xff] }
  0xa1   : > { %1324 = vmatpush.msra.mxu2 %v2487_v43  ;;  %1075 = vmatpush.msra.mxu0 %v1874_v42 }
  0xa2   : > { %583 = vrot.lane.b32.xlu2 %v497_v6, %s2093_s8  ;;  %v758_v6 = vrot.slane %v2415_v52, 2  ;;  %1193 = vmatpush.msra.mxu1 %v959_v60 }
  0xa4   : > { %v759_v9 = vsel %vm681_vm2, %v757_v5, %v758_v6 }
  0xa8   : > { %782 = vrot.lane.b32.xlu1 %v696_v7, %s2092_s7  ;;  %627 = vrot.lane.b32.xlu0 %v552_v8, %s2093_s8  ;;  %v704_v7 = vsel %vm681_vm2, %v702_v2, %v703_v3  ;;  %v507_v8 = vsel %vm482_vm3, %v504_v61, %v506_v4  ;;  %v1871_v61 = vld [vmem:[%s2168_s6 + $0x38] sm:$0xff]  ;;  %v1870_v2 = vld [vmem:[%s2168_s6 + $0x30] sm:$0xff] }
  0xaa   : > { %826 = vrot.lane.b32.xlu2 %v751_v14, %s2092_s7  ;;  %v760_v14 = vrot.slane %v421_v10, 2 }
  0xac   : > { %v761_v21 = vsel %vm681_vm2, %v758_v6, %v760_v14  ;;  %v2508_v6 = vld [vmem:[#allocation2 + $0x90] sm:$0xff] }
  0xad   : > { %v513_v14 = vrot.slane %v2508_v6, 1 }
  0xb0   : > { %579 = vrot.lane.b32.xlu1 %v492_v15, %s2093_s8  ;;  %575 = vrot.lane.b32.xlu0 %v487_v16, %s2093_s8  ;;  %v705_v15 = vrot.slane %v388_v1, 2  ;;  %v562_v16 = vsel %vm482_vm3, %v559_v59, %v561_v11  ;;  %v763_v59 = vrot.slane %v2468_v28, 2  ;;  %v958_v1 = vld [vmem:[%s2168_s6 + $0x20] sm:$0xff]  ;;  %v955_v11 = vld [vmem:[%s2168_s6 + $0x8] sm:$0xff] }
  0xb1   : > { %1194 = vmatpush.msra.mxu1 %v958_v1 }
  0xb2   : > { %774 = vrot.lane.b32.xlu2 %v686_v23, %s2092_s7  ;;  %v706_v22 = vsel %vm681_vm2, %v703_v3, %v705_v15  ;;  %v2460_v23 = vld [vmem:[#allocation2 + $0x78] sm:$0xff] }
  0xb3   : > { %v508_v29 = vrot.slane %v2460_v23, 1  ;;  %v707_v35 = vrot.slane %v2460_v23, 2  ;;  %v957_v3 = vld [vmem:[%s2168_s6 + $0x18] sm:$0xff] }
  0xb4   : > { %1195 = vmatpush.msra.mxu1 %v957_v3 }
  0xb8   : > { %585 = vrot.lane.b32.xlu1 %v500_v24, %s2093_s8  ;;  %778 = vrot.lane.b32.xlu0 %v691_v25, %s2092_s7  ;;  %v2464_v24 = vld [vmem:[#allocation2 + $0x80] sm:$0xff] }
  0xb9   : > { %v2466_v25 = vld [vmem:[#allocation2 + $0x180] sm:$0xff]  ;;  %v509_v30 = vrot.slane %v2464_v24, 1 }
  0xba   : > { %629 = vrot.lane.b32.xlu2 %v555_v36, %s2093_s8  ;;  %v708_v36 = vrot.slane %v2464_v24, 2  ;;  %v762_v57 = vrot.slane %v2466_v25, 2 }
  0xbb   : > { %v510_v41 = vsel %vm482_vm3, %v508_v29, %v509_v30 }
  0xbc   : > { %v709_v45 = vsel %vm681_vm2, %v707_v35, %v708_v36  ;;  %v2527_v35 = vld [vmem:[#allocation2 + $0x128] sm:$0xff] }
  0xbd   : > { %v743_v42 = vrot.slane %v2527_v35, 2 }
  0xc0   : > { %828 = vrot.lane.b32.xlu1 %v754_v37, %s2092_s7  ;;  %784 = vrot.lane.b32.xlu0 %v699_v38, %s2092_s7  ;;  %v563_v37 = vrot.slane %v2466_v25, 1  ;;  %v564_v38 = vrot.slane %v2468_v28, 1 }
  0xc2   : > { %587 = vrot.lane.b32.xlu2 %v502_v47, %s2093_s8  ;;  %v565_v46 = vsel %vm482_vm3, %v563_v37, %v564_v38  ;;  %v1873_v47 = vld [vmem:[%s2168_s6 + $0x48] sm:$0xff]  ;;  %v543_v37 = vrot.slane %v2524_v31, 1 }
  0xc3   : > { %1990 = vmatpush.msra.mxu3 %v1873_v47  ;;  %1076 = vmatpush.msra.mxu0 %v1873_v47 }
  0xc5   : > { %1991 = vmatpush.msra.mxu3 %v1872_v58  ;;  %1077 = vmatpush.msra.mxu0 %v1872_v58  ;;  %v412_v58 = vld [vmem:[#allocation2 + $0x130] sm:$0x3] }
  0xc7   : > { %1992 = vmatpush.msra.mxu3 %v1871_v61  ;;  %1078 = vmatpush.msra.mxu0 %v1871_v61 }
  0xc8   : > { %786 = vrot.lane.b32.xlu1 %v701_v49, %s2092_s7  ;;  %631 = vrot.lane.b32.xlu0 %v557_v50, %s2093_s8  ;;  %v424_v49 = vld [vmem:[#allocation2 + $0x190] sm:$0x3]  ;;  %v391_v50 = vld [vmem:[#allocation2 + $0x88] sm:$0x3] }
  0xc9   : > { %1993 = vmatpush.msra.mxu3 %v1870_v2  ;;  %1079 = vmatpush.msra.mxu0 %v1870_v2 }
  0xca   : > { %830 = vrot.lane.b32.xlu2 %v756_v62, %s2092_s7  ;;  %v566_v62 = vrot.slane %v424_v49, 1 }
  0xcb   : > { %1994 = vmatpush.msrb.mxu3 %v959_v60 }
  0xcc   : > { %v567_v4 = vsel %vm482_vm3, %v564_v38, %v566_v62  ;;  %v546_v62 = vrot.slane %v412_v58, 1 }
  0xcd   : > { %1995 = vmatpush.msrb.mxu3 %v958_v1 }
  0xcf   : > { %1996 = vmatpush.msrb.mxu3 %v957_v3 }
  0xd0   : > { %633 = vrot.lane.b32.xlu1 %v560_v63, %s2093_s8  ;;  %589 = vrot.lane.b32.xlu0 %v505_v0, %s2093_s8  ;;  %v511_v63 = vrot.slane %v391_v50, 1  ;;  %v764_v0 = vsel %vm681_vm2, %v762_v57, %v763_v59  ;;  %v394_v57 = vld [vmem:[#allocation2 + $0xa0] sm:$0x3] }
  0xd1   : > { %v715_v61 = vrot.slane %v394_v57, 2 }
  0xd2   : > { %788 = vrot.lane.b32.xlu2 %v704_v7, %s2092_s7  ;;  %v512_v5 = vsel %vm482_vm3, %v509_v30, %v511_v63  ;;  %v2510_v7 = vld [vmem:[#allocation2 + $0x98] sm:$0xff] }
  0xd3   : > { %v514_v15 = vrot.slane %v2510_v7, 1 }
  0xd5   : > { %v515_v29 = vsel %vm482_vm3, %v513_v14, %v514_v15 }
  0xd8   : > { %591 = vrot.lane.b32.xlu1 %v507_v8, %s2093_s8  ;;  %832 = vrot.lane.b32.xlu0 %v759_v9, %s2092_s7  ;;  %v710_v8 = vrot.slane %v391_v50, 2  ;;  %v956_v9 = vld [vmem:[%s2168_s6 + $0x10] sm:$0xff] }
  0xd9   : > { %1196 = vmatpush.msra.mxu1 %v956_v9  ;;  %1997 = vmatpush.msrb.mxu3 %v956_v9  ;;  %v2560_v9 = vld [vmem:[#allocation2 + $0xb0] sm:$0xff] }
  0xda   : > { %635 = vrot.lane.b32.xlu2 %v562_v16, %s2093_s8  ;;  %v765_v16 = vrot.slane %v424_v49, 2 }
  0xdb   : > { %1197 = vmatpush.msra.mxu1 %v955_v11  ;;  %1998 = vmatpush.msrb.mxu3 %v955_v11  ;;  %v745_v11 = vrot.slane %v412_v58, 2 }
  0xdc   : > { %v766_v30 = vsel %vm681_vm2, %v763_v59, %v765_v16  ;;  %v516_v59 = vrot.slane %v394_v57, 1 }
  0xde   : > { %v517_v1 = vsel %vm482_vm3, %v514_v15, %v516_v59  ;;  %v519_v15 = vrot.slane %v2560_v9, 1 }
  0xe0   : > { %834 = vrot.lane.b32.xlu1 %v761_v21, %s2092_s7  ;;  %790 = vrot.lane.b32.xlu0 %v706_v22, %s2092_s7  ;;  %v711_v21 = vsel %vm681_vm2, %v708_v36, %v710_v8  ;;  %v954_v22 = vld [vmem:[%s2168_s6] sm:$0xff]  ;;  %v544_v36 = vrot.slane %v2527_v35, 1  ;;  %v2558_v8 = vld [vmem:[#allocation2 + $0xa8] sm:$0xff] }
  0xe1   : > { %1198 = vmatpush.msra.mxu1 %v954_v22  ;;  %1999 = vmatpush.msrb.mxu3 %v954_v22  ;;  %v717_v16 = vrot.slane %v2558_v8, 2 }
  0xe2   : > { %593 = vrot.lane.b32.xlu2 %v510_v41, %s2093_s8  ;;  %v742_v41 = vrot.slane %v2524_v31, 2  ;;  %v545_v47 = vsel %vm482_vm3, %v543_v37, %v544_v36 }
  0xe4   : > { %v744_v49 = vsel %vm681_vm2, %v742_v41, %v743_v42 }
  0xe8   : > { %792 = vrot.lane.b32.xlu1 %v709_v45, %s2092_s7  ;;  %637 = vrot.lane.b32.xlu0 %v565_v46, %s2093_s8  ;;  %v712_v45 = vrot.slane %v2508_v6, 2  ;;  %v713_v46 = vrot.slane %v2510_v7, 2 }
  0xea   : > { %836 = vrot.lane.b32.xlu2 %v764_v0, %s2092_s7  ;;  %v714_v50 = vsel %vm681_vm2, %v712_v45, %v713_v46 }
  0xec   : > { %v2513_v10 = vpop.permute.xlu2 %573 }
  0xed   : > { %v881_v59 = vsel %vm880_vm4, %v2338_v44, %v2513_v10 }
  0xf0   : > { %639 = vrot.lane.b32.xlu1 %v567_v4, %s2093_s8  ;;  %595 = vrot.lane.b32.xlu0 %v512_v5, %s2093_s8  ;;  %v716_v4 = vsel %vm681_vm2, %v713_v46, %v715_v61  ;;  %v547_v5 = vsel %vm482_vm3, %v544_v36, %v546_v62  ;;  %v397_v46 = vld [vmem:[#allocation2 + $0xb8] sm:$0x3] }
  0xf2   : > { %794 = vrot.lane.b32.xlu2 %v711_v21, %s2092_s7  ;;  %v718_v21 = vrot.slane %v2560_v9, 2 }
  0xf4   : > { %v2530_v38 = vpop.permute.xlu2 %577  ;;  %v719_v45 = vsel %vm681_vm2, %v717_v16, %v718_v21 }
  0xf8   : > { %597 = vrot.lane.b32.xlu1 %v515_v29, %s2093_s8  ;;  %838 = vrot.lane.b32.xlu0 %v766_v30, %s2092_s7  ;;  %v746_v30 = vsel %vm681_vm2, %v743_v42, %v745_v11  ;;  %v521_v42 = vrot.slane %v397_v46, 1 }
  0xfa   : > { %621 = vrot.lane.b32.xlu2 %v545_v47, %s2093_s8  ;;  %v2579_v47 = vld [vmem:[#allocation2 + $0xc0] sm:$0xff] }
  0xfb   : > { %v523_v57 = vrot.slane %v2579_v47, 1  ;;  %v722_v10 = vrot.slane %v2579_v47, 2 }
  0xfc   : > { %v2543_v60 = vpop.permute.xlu2 %583 }
 0x100   : > { %820 = vrot.lane.b32.xlu1 %v744_v49, %s2092_s7  ;;  %796 = vrot.lane.b32.xlu0 %v714_v50, %s2092_s7  ;;  %v2581_v49 = vld [vmem:[#allocation2 + $0xc8] sm:$0xff]  ;;  %v720_v50 = vrot.slane %v397_v46, 2 }
 0x101   : > { %v524_v58 = vrot.slane %v2581_v49, 1 }
 0x102   : > { %v781_v63 = vpop.permute.xlu1 %780  ;;  %v582_v0 = vpop.permute.xlu0 %581  ;;  %599 = vrot.lane.b32.xlu2 %v517_v1, %s2093_s8  ;;  %v721_v44 = vsel %vm681_vm2, %v718_v21, %v720_v50  ;;  %v403_v21 = vld [vmem:[#allocation2 + $0xe8] sm:$0x3] }
 0x103   : > { %v885_v2 = vsel %vm880_vm4, %v2321_v33, %v582_v0  ;;  %v518_v33 = vrot.slane %v2558_v8, 1 }
 0x104   : > { %v2551_v3 = vsel %vm917_vm5, %v885_v2, %v781_v63  ;;  %v827_v14 = vpop.permute.xlu2 %826  ;;  %v522_v63 = vsel %vm482_vm3, %v519_v15, %v521_v42 }
 0x105   : > { %1946 = vmatmul.msk.f32.vlgmr.msra.gmra.mxu2 %vm967_vm6, %v2551_v3  ;;  %v520_v41 = vsel %vm482_vm3, %v518_v33, %v519_v15 }
 0x108   : > { %798 = vrot.lane.b32.xlu1 %v716_v4, %s2092_s7  ;;  %623 = vrot.lane.b32.xlu0 %v547_v5, %s2093_s8 }
 0x10a   : > { %v825_v22 = vpop.permute.xlu1 %824  ;;  %v626_v29 = vpop.permute.xlu0 %625  ;;  %822 = vrot.lane.b32.xlu2 %v746_v30, %s2092_s7 }
 0x10b   : > { %v907_v37 = vsel %vm880_vm4, %v2329_v39, %v626_v29 }
 0x10c   : > { %v2572_v36 = vsel %vm917_vm5, %v907_v37, %v825_v22  ;;  %v775_v39 = vpop.permute.xlu2 %774  ;;  %v531_v37 = vrot.slane %v403_v21, 1 }
 0x10d   : > { %1900 = vmatmul.msk.f32.vlgmr.msra.gmra.mxu3 %vm967_vm6, %v2572_v36 }
 0x10e   : > { %2000 = vmatpush.msra.mxu3 %v2444_v12  ;;  %v883_v12 = vsel %vm880_vm4, %v2350_v54, %v2530_v38  ;;  %v525_v54 = vsel %vm482_vm3, %v523_v57, %v524_v58 }
 0x110   : > { %601 = vrot.lane.b32.xlu0 %v520_v41, %s2093_s8  ;;  %800 = vrot.lane.b32.xlu1 %v719_v45, %s2092_s7 }
 0x111   : > { %2001 = vmatpush.msra.mxu3 %v2447_v13  ;;  %v400_v13 = vld [vmem:[#allocation2 + $0xd0] sm:$0x3] }
 0x112   : > { %v777_v61 = vpop.permute.xlu1 %776  ;;  %v773_v62 = vpop.permute.xlu0 %772  ;;  %603 = vrot.lane.b32.xlu2 %v522_v63, %s2093_s8  ;;  %v526_v2 = vrot.slane %v400_v13, 1  ;;  %v725_v4 = vrot.slane %v400_v13, 2 }
 0x113   : > { %v2597_v0 = vsel %vm917_vm5, %v883_v12, %v777_v61  ;;  %v918_v1 = vsel %vm917_vm5, %v881_v59, %v773_v62  ;;  %2002 = vmatpush.msra.mxu3 %v2452_v19  ;;  %v723_v19 = vrot.slane %v2581_v49, 2  ;;  %v2654_v59 = vld [vmem:[#allocation2 + $0xf8] sm:$0xff] }
 0x114   : > { %1876 = vmatmul.msk.f32.vlgmr.msra.gmra.mxu0 %vm967_vm6, %v2597_v0  ;;  %1908 = vmatmul.msk.f32.vlgmr.msra.gmra.mxu1 %vm967_vm6, %v918_v1  ;;  %v2609_v38 = vpop.permute.xlu2 %629  ;;  %v534_v62 = vrot.slane %v2654_v59, 1  ;;  %v733_v1 = vrot.slane %v2654_v59, 2 }
 0x115   : > { %2003 = vmatpush.msra.mxu3 %v2456_v20  ;;  %v886_v20 = vsel %vm880_vm4, %v2323_v34, %v2543_v60  ;;  %v724_v33 = vsel %vm681_vm2, %v722_v10, %v723_v19  ;;  %v527_v34 = vsel %vm482_vm3, %v524_v58, %v526_v2  ;;  %v2635_v60 = vld [vmem:[#allocation2 + $0xd8] sm:$0xff]  ;;  %v2652_v58 = vld [vmem:[#allocation2 + $0xf0] sm:$0xff] }
 0x116   : > { %v528_v12 = vrot.slane %v2635_v60, 1  ;;  %v732_v63 = vrot.slane %v2652_v58, 2 }
 0x117   : > { %2004 = vmatpush.msra.mxu3 %v2477_v32 }
 0x118   : > { %802 = vrot.lane.b32.xlu0 %v721_v44, %s2092_s7  ;;  %605 = vrot.lane.b32.xlu1 %v525_v54, %s2093_s8  ;;  %v734_v2 = vsel %vm681_vm2, %v732_v63, %v733_v1 }
 0x119   : > { %2005 = vmatpush.msra.mxu3 %v2487_v43  ;;  %v726_v43 = vsel %vm681_vm2, %v723_v19, %v725_v4  ;;  %v406_v4 = vld [vmem:[#allocation2 + $0x100] sm:$0x3] }
 0x11a   : > { %v783_v5 = vpop.permute.xlu1 %782  ;;  %v628_v11 = vpop.permute.xlu0 %627  ;;  %804 = vrot.lane.b32.xlu2 %v724_v33, %s2092_s7  ;;  %v735_v33 = vrot.slane %v406_v4, 2 }
 0x11b   : > { %v908_v32 = vsel %vm880_vm4, %v2331_v40, %v628_v11  ;;  %v2623_v15 = vsel %vm917_vm5, %v886_v20, %v783_v5  ;;  %v2637_v40 = vld [vmem:[#allocation2 + $0xe0] sm:$0xff]  ;;  %v2673_v20 = vld [vmem:[#allocation2 + $0x108] sm:$0xff]  ;;  %v2675_v5 = vld [vmem:[#allocation2 + $0x110] sm:$0xff]  ;;  %v730_v11 = vrot.slane %v403_v21, 2 }
 0x11c   : > { %1947 = vmatmul.msk.f32.gmra.mxu2 %vm967_vm6, %v2623_v15  ;;  %v2628_v16 = vsel %vm917_vm5, %v908_v32, %v827_v14  ;;  %v2639_v22 = vpop.permute.xlu2 %587  ;;  %v727_v14 = vrot.slane %v2635_v60, 2  ;;  %v728_v29 = vrot.slane %v2637_v40, 2  ;;  %v529_v30 = vrot.slane %v2637_v40, 1 }
 0x11d   : > { %1901 = vmatmul.msk.f32.gmra.mxu3 %vm967_vm6, %v2628_v16  ;;  %v538_v32 = vrot.slane %v2673_v20, 1 }
 0x11e   : > { %v729_v50 = vsel %vm681_vm2, %v727_v14, %v728_v29  ;;  %v532_v57 = vsel %vm482_vm3, %v529_v30, %v531_v37 }
 0x120   : > { %607 = vrot.lane.b32.xlu0 %v527_v34, %s2093_s8  ;;  %806 = vrot.lane.b32.xlu1 %v726_v43, %s2092_s7  ;;  %v909_v43 = vsel %vm880_vm4, %v2390_v26, %v2609_v38  ;;  %v409_v38 = vld [vmem:[#allocation2 + $0x118] sm:$0x3] }
 0x122   : > { %v580_v41 = vpop.permute.xlu1 %579  ;;  %v576_v45 = vpop.permute.xlu0 %575 }
 0x123   : > { %v882_v46 = vsel %vm880_vm4, %v2343_v48, %v576_v45  ;;  %v530_v48 = vsel %vm482_vm3, %v528_v12, %v529_v30  ;;  %v884_v44 = vsel %vm880_vm4, %v2352_v55, %v580_v41  ;;  %v731_v55 = vsel %vm681_vm2, %v728_v29, %v730_v11  ;;  %v2746_v11 = vld [vmem:[#allocation2 + $0x1a0] sm:$0xff] }
 0x124   : > { %v919_v42 = vsel %vm917_vm5, %v882_v46, %v775_v39  ;;  %v831_v61 = vpop.permute.xlu2 %830  ;;  %v533_v39 = vrot.slane %v2652_v58, 1  ;;  %609 = vrot.lane.b32.xlu2 %v530_v48, %s2093_s8  ;;  %v541_v41 = vrot.slane %v409_v38, 1  ;;  %v738_v45 = vrot.slane %v2675_v5, 2 }
 0x125   : > { %1909 = vmatmul.msk.f32.gmra.mxu1 %vm967_vm6, %v919_v42  ;;  %v740_v46 = vrot.slane %v409_v38, 2  ;;  %v888_v42 = vsel %vm880_vm4, %v2381_v18, %v2639_v22 }
 0x126   : > { %v535_v19 = vsel %vm482_vm3, %v533_v39, %v534_v62 }
 0x127   : > { %v741_v22 = vsel %vm681_vm2, %v738_v45, %v740_v46 }
 0x128   : > { %808 = vrot.lane.b32.xlu0 %v729_v50, %s2092_s7  ;;  %611 = vrot.lane.b32.xlu1 %v532_v57, %s2093_s8 }
 0x12a   : > { %v586_v54 = vpop.permute.xlu1 %585  ;;  %v779_v13 = vpop.permute.xlu0 %778 }
 0x12b   : > { %v921_v10 = vsel %vm917_vm5, %v884_v44, %v779_v13  ;;  %v887_v34 = vsel %vm880_vm4, %v2379_v17, %v586_v54  ;;  %v736_v17 = vsel %vm681_vm2, %v733_v1, %v735_v33 }
 0x12c   : > { %1877 = vmatmul.msk.f32.gmra.mxu0 %vm967_vm6, %v921_v10  ;;  %810 = vrot.lane.b32.xlu2 %v731_v55, %s2092_s7  ;;  %v789_v37 = vpop.permute.xlu2 %788 }
 0x12d   : > { %1910 = vmatmul.msk.f32.gmra.mxu1 %vm967_vm6, %v2597_v0  ;;  %v539_v0 = vrot.slane %v2675_v5, 1 }
 0x12f   : > { %v540_v26 = vsel %vm482_vm3, %v538_v32, %v539_v0  ;;  %v542_v18 = vsel %vm482_vm3, %v539_v0, %v541_v41 }
 0x130   : > { %613 = vrot.lane.b32.xlu0 %v535_v19, %s2093_s8  ;;  %812 = vrot.lane.b32.xlu1 %v734_v2, %s2092_s7 }
 0x132   : > { %v829_v21 = vpop.permute.xlu1 %828  ;;  %v785_v14 = vpop.permute.xlu0 %784 }
 0x133   : > { %v2689_v30 = vsel %vm917_vm5, %v909_v43, %v829_v21  ;;  %v924_v29 = vsel %vm917_vm5, %v887_v34, %v785_v14 }
 0x134   : > { %1878 = vmatmul.msk.f32.gmra.mxu0 %vm967_vm6, %v2551_v3  ;;  %1902 = vmatmul.msk.f32.gmra.mxu3 %vm967_vm6, %v2689_v30  ;;  %v636_v63 = vpop.permute.xlu2 %635 }
 0x135   : > { %1948 = vmatmul.msk.f32.gmra.mxu2 %vm967_vm6, %v924_v29  ;;  %1911 = vmatmul.msk.f32.gmra.mxu1 %vm967_vm6, %v921_v10  ;;  %v912_v34 = vsel %vm880_vm4, %v2415_v52, %v636_v63  ;;  %v569_v52 = vrot.slane %v2746_v11, 1 }
 0x138   : > { %814 = vrot.lane.b32.xlu0 %v736_v17, %s2092_s7  ;;  %617 = vrot.lane.b32.xlu1 %v540_v26, %s2093_s8 }
 0x13a   : > { %v787_v50 = vpop.permute.xlu1 %786  ;;  %v632_v57 = vpop.permute.xlu0 %631 }
 0x13b   : > { %v910_v12 = vsel %vm880_vm4, %v2393_v27, %v632_v57  ;;  %v925_v48 = vsel %vm917_vm5, %v888_v42, %v787_v50  ;;  %v536_v27 = vrot.slane %v406_v4, 1 }
 0x13c   : > { %1879 = vmatmul.msk.f32.gmra.mxu0 %vm967_vm6, %v2623_v15  ;;  %v2712_v39 = vsel %vm917_vm5, %v910_v12, %v831_v61  ;;  %v594_v10 = vpop.permute.xlu2 %593 }
 0x13d   : > { %1949 = vmatmul.msk.f32.gmra.mxu2 %vm967_vm6, %v925_v48  ;;  %1903 = vmatmul.msk.f32.gmra.mxu3 %vm967_vm6, %v2712_v39  ;;  %v537_v61 = vsel %vm482_vm3, %v534_v62, %v536_v27  ;;  %v891_v26 = vsel %vm880_vm4, %v2460_v23, %v594_v10 }
 0x13e   : > { %1912 = vmatmul.msk.f32.gmra.mxu1 %vm967_vm6, %v2551_v3  ;;  %615 = vrot.lane.b32.xlu2 %v537_v61, %s2093_s8  ;;  %v737_v3 = vrot.slane %v2673_v20, 2 }
 0x140   : > { %619 = vrot.lane.b32.xlu0 %v542_v18, %s2093_s8  ;;  %818 = vrot.lane.b32.xlu1 %v741_v22, %s2092_s7  ;;  %v739_v62 = vsel %vm681_vm2, %v737_v3, %v738_v45 }
 0x142   : > { %v634_v1 = vpop.permute.xlu1 %633  ;;  %v590_v44 = vpop.permute.xlu0 %589 }
 0x143   : > { %v889_v54 = vsel %vm880_vm4, %v2417_v53, %v590_v44  ;;  %v911_v19 = vsel %vm880_vm4, %v2412_v51, %v634_v1  ;;  %v768_v51 = vrot.slane %v2746_v11, 2 }
 0x144   : > { %1880 = vmatmul.msk.f32.gmra.mxu0 %vm967_vm6, %v924_v29  ;;  %v926_v13 = vsel %vm917_vm5, %v889_v54, %v789_v37  ;;  %v837_v33 = vpop.permute.xlu2 %836 }
 0x145   : > { %1950 = vmatmul.msk.f32.gmra.mxu2 %vm967_vm6, %v926_v13 }
 0x146   : > { %1913 = vmatmul.msk.f32.gmra.mxu1 %vm967_vm6, %v2623_v15  ;;  %816 = vrot.lane.b32.xlu2 %v739_v62, %s2092_s7  ;;  %v2744_v15 = vld [vmem:[#allocation2 + $0x198] sm:$0xff] }
 0x147   : > { %v767_v55 = vrot.slane %v2744_v15, 2  ;;  %v568_v63 = vrot.slane %v2744_v15, 1 }
 0x149   : > { %v769_v32 = vsel %vm681_vm2, %v767_v55, %v768_v51  ;;  %v570_v18 = vsel %vm482_vm3, %v568_v63, %v569_v52 }
 0x14a   : > { %v592_v53 = vpop.permute.xlu1 %591  ;;  %v833_v2 = vpop.permute.xlu0 %832  ;;  %840 = vrot.lane.b32.xlu0 %v769_v32, %s2092_s7 }
 0x14b   : > { %v2738_v4 = vsel %vm917_vm5, %v911_v19, %v833_v2  ;;  %v890_v0 = vsel %vm880_vm4, %v2419_v56, %v592_v53  ;;  %v427_v56 = vld [vmem:[#allocation2 + $0x1a8] sm:$0x3] }
 0x14c   : > { %1881 = vmatmul.msk.f32.gmra.mxu0 %vm967_vm6, %v925_v48  ;;  %1904 = vmatmul.msk.f32.gmra.mxu3 %vm967_vm6, %v2738_v4  ;;  %v571_v37 = vrot.slane %v427_v56, 1  ;;  %v795_v42 = vpop.permute.xlu2 %794  ;;  %v770_v44 = vrot.slane %v427_v56, 2 }
 0x14e   : > { %1914 = vmatmul.msk.f32.gmra.mxu1 %vm967_vm6, %v924_v29  ;;  %v572_v17 = vsel %vm482_vm3, %v569_v52, %v571_v37  ;;  %641 = vrot.lane.b32.xlu2 %v570_v18, %s2093_s8  ;;  %v771_v54 = vsel %vm681_vm2, %v768_v51, %v770_v44 }
 0x14f   : > { %643 = vrot.lane.b32.xlu1 %v572_v17, %s2093_s8 }
 0x152   : > { %v835_v43 = vpop.permute.xlu1 %834  ;;  %v791_v21 = vpop.permute.xlu0 %790 }
 0x153   : > { %v2757_v14 = vsel %vm917_vm5, %v912_v34, %v835_v43  ;;  %v927_v29 = vsel %vm917_vm5, %v890_v0, %v791_v21 }
 0x154   : > { %1882 = vmatmul.msk.f32.gmra.mxu0 %vm967_vm6, %v926_v13  ;;  %1905 = vmatmul.msk.f32.gmra.mxu3 %vm967_vm6, %v2757_v14 }
 0x155   : > { %1951 = vmatmul.msk.f32.gmra.mxu2 %vm967_vm6, %v927_v29 }
 0x156   : > { %1915 = vmatmul.msk.f32.gmra.mxu1 %vm967_vm6, %v925_v48  ;;  %v622_v48 = vpop.permute.xlu2 %621  ;;  %842 = vrot.lane.b32.xlu2 %v771_v54, %s2092_s7 }
 0x15a   : > { %v793_v38 = vpop.permute.xlu1 %792  ;;  %v638_v41 = vpop.permute.xlu0 %637 }
 0x15b   : > { %v913_v45 = vsel %vm880_vm4, %v2466_v25, %v638_v41  ;;  %v928_v46 = vsel %vm917_vm5, %v891_v26, %v793_v38  ;;  %v2850_v26 = vld [vmem:[%s211_s27] ss:$0 sm:$0xff] }
 0x15c   : > { %1883 = vmatmul.msk.f32.gmra.mxu0 %vm967_vm6, %v927_v29  ;;  %v2775_v50 = vsel %vm917_vm5, %v913_v45, %v837_v33 }
 0x15d   : > { %1952 = vmatmul.msk.f32.gmra.mxu2 %vm967_vm6, %v928_v46  ;;  %1906 = vmatmul.msk.f32.gmra.mxu3 %vm967_vm6, %v2775_v50 }
 0x15e   : > { %1916 = vmatmul.msk.f32.gmra.mxu1 %vm967_vm6, %v926_v13  ;;  %v600_v1 = vpop.permute.xlu2 %599 }
 0x162   : > { %v640_v23 = vpop.permute.xlu1 %639  ;;  %v596_v57 = vpop.permute.xlu0 %595 }
 0x163   : > { %v892_v25 = vsel %vm880_vm4, %v2464_v24, %v596_v57  ;;  %v914_v22 = vsel %vm880_vm4, %v2468_v28, %v640_v23  ;;  %v905_v28 = vsel %vm880_vm4, %v2524_v31, %v622_v48  ;;  %v894_v31 = vsel %vm880_vm4, %v2510_v7, %v600_v1 }
 0x164   : > { %1884 = vmatmul.msk.f32.gmra.mxu0 %vm967_vm6, %v928_v46  ;;  %v929_v12 = vsel %vm917_vm5, %v892_v25, %v795_v42 }
 0x165   : > { %1953 = vmatmul.msk.f32.gmra.mxu2 %vm967_vm6, %v929_v12 }
 0x166   : > { %1917 = vmatmul.msk.f32.gmra.mxu1 %vm967_vm6, %v927_v29 }
 0x16a   : > { %v598_v27 = vpop.permute.xlu1 %597  ;;  %v839_v24 = vpop.permute.xlu0 %838 }
 0x16b   : > { %v2793_v61 = vsel %vm917_vm5, %v914_v22, %v839_v24  ;;  %v893_v13 = vsel %vm880_vm4, %v2508_v6, %v598_v27  ;;  %v823_v6 = vpop.permute.xlu2 %822 }
 0x16c   : > { %1885 = vmatmul.msk.f32.gmra.mxu0 %vm967_vm6, %v929_v12  ;;  %1907 = vmatmul.msk.f32.gmra.mxu3 %vm967_vm6, %v2793_v61 }
 0x16e   : > { %1918 = vmatmul.msk.f32.gmra.mxu1 %vm967_vm6, %v928_v46 }
 0x172   : > { %v821_v3 = vpop.permute.xlu1 %820  ;;  %v797_v10 = vpop.permute.xlu0 %796 }
 0x173   : > { %v2806_v62 = vsel %vm917_vm5, %v905_v28, %v821_v3  ;;  %v930_v19 = vsel %vm917_vm5, %v893_v13, %v797_v10  ;;  %v604_v34 = vpop.permute.xlu2 %603 }
 0x174   : > { %1886 = vmatmul.msk.f32.gmra.mxu0 %vm967_vm6, %v930_v19  ;;  %1932 = vmatmul.msk.f32.vlgmr.msrb.gmra.mxu3 %vm967_vm6, %v2806_v62  ;;  %v896_v43 = vsel %vm880_vm4, %v2560_v9, %v604_v34 }
 0x175   : > { %1954 = vmatmul.msk.f32.gmra.mxu2 %vm967_vm6, %v930_v19 }
 0x176   : > { %1919 = vmatmul.msk.f32.gmra.mxu1 %vm967_vm6, %v929_v12 }
 0x17a   : > { %v799_v53 = vpop.permute.xlu1 %798  ;;  %v624_v2 = vpop.permute.xlu0 %623 }
 0x17b   : > { %v906_v55 = vsel %vm880_vm4, %v2527_v35, %v624_v2  ;;  %v931_v51 = vsel %vm917_vm5, %v894_v31, %v799_v53  ;;  %v805_v52 = vpop.permute.xlu2 %804 }
 0x17c   : > { %1887 = vmatmul.msk.f32.gmra.mxu0 %vm967_vm6, %v931_v51  ;;  %v2821_v33 = vsel %vm917_vm5, %v906_v55, %v823_v6 }
 0x17d   : > { %1955 = vmatmul.msk.f32.gmra.mxu2 %vm967_vm6, %v931_v51  ;;  %1933 = vmatmul.msk.f32.gmra.mxu3 %vm967_vm6, %v2821_v33 }
 0x17e   : > { %1920 = vmatmul.msk.f32.gmra.mxu1 %vm967_vm6, %v930_v19 }
 0x182   : > { %v602_v7 = vpop.permute.xlu0 %601  ;;  %v801_v32 = vpop.permute.xlu1 %800 }
 0x183   : > { %v895_v0 = vsel %vm880_vm4, %v2558_v8, %v602_v7  ;;  %v610_v25 = vpop.permute.xlu2 %609 }
 0x184   : > { %v932_v35 = vsel %vm917_vm5, %v895_v0, %v801_v32  ;;  %v899_v12 = vsel %vm880_vm4, %v2635_v60, %v610_v25 }
 0x185   : > { %1888 = vmatmul.msk.f32.gmra.mxu0 %vm967_vm6, %v932_v35  ;;  %1934 = vmatmul.msk.f32.gmra.mxu3 %vm967_vm6, %v2572_v36 }
 0x186   : > { %1921 = vmatmul.msk.f32.gmra.mxu1 %vm967_vm6, %v931_v51  ;;  %1956 = vmatmul.msk.f32.gmra.mxu2 %vm967_vm6, %v932_v35 }
 0x188   : > { %v1326_v41 = vpop.f32.mrf.mxu2 }
 0x18a   : > { %v803_v21 = vpop.permute.xlu0 %802  ;;  %v606_v8 = vpop.permute.xlu1 %605 }
 0x18b   : > { %v933_v29 = vsel %vm917_vm5, %v896_v43, %v803_v21  ;;  %v897_v56 = vsel %vm880_vm4, %v2579_v47, %v606_v8  ;;  %v811_v27 = vpop.permute.xlu2 %810 }
 0x18c   : > { %v934_v38 = vsel %vm917_vm5, %v897_v56, %v805_v52 }
 0x18d   : > { %1889 = vmatmul.msk.f32.gmra.mxu0 %vm967_vm6, %v933_v29  ;;  %1935 = vmatmul.msk.f32.gmra.mxu3 %vm967_vm6, %v2628_v16 }
 0x18e   : > { %1922 = vmatmul.msk.f32.gmra.mxu1 %vm967_vm6, %v932_v35  ;;  %1957 = vmatmul.msk.f32.gmra.mxu2 %vm967_vm6, %v933_v29 }
 0x190   : > { %v2890_v19 = vpop.f32.mrf.mxu3 }
 0x191   : > { %v1081_v37 = vpop.f32.mrf.mxu0  ;;  %v1200_v17 = vpop.f32.mrf.mxu1 }
 0x192   : > { %v1201_v9 = vadd.f32 %v1200_v17, %v1081_v37  ;;  %v608_v46 = vpop.permute.xlu0 %607  ;;  %v807_v23 = vpop.permute.xlu1 %806 }
 0x193   : > { %v898_v42 = vsel %vm880_vm4, %v2581_v49, %v608_v46 }
 0x194   : > { %v1422_v45 = vadd.f32 %v1326_v41, %v1201_v9  ;;  %v935_v57 = vsel %vm917_vm5, %v898_v42, %v807_v23 }
 0x195   : > { %1890 = vmatmul.msk.f32.gmra.mxu0 %vm967_vm6, %v934_v38  ;;  %1936 = vmatmul.msk.f32.gmra.mxu3 %vm967_vm6, %v2689_v30 }
 0x196   : > { %v2857_v47 = vadd.f32 %v2850_v26, %v1422_v45  ;;  %1923 = vmatmul.msk.f32.gmra.mxu1 %vm967_vm6, %v933_v29  ;;  %1958 = vmatmul.msk.f32.gmra.mxu2 %vm967_vm6, %v934_v38 }
 0x198   : > { %v616_v55 = vpop.permute.xlu2 %615 }
 0x19a   : > { %v809_v48 = vpop.permute.xlu0 %808  ;;  %v612_v18 = vpop.permute.xlu1 %611 }
 0x19b   : > { %v936_v49 = vsel %vm917_vm5, %v899_v12, %v809_v48  ;;  %v900_v22 = vsel %vm880_vm4, %v2637_v40, %v612_v18 }
 0x19c   : > { %v937_v44 = vsel %vm917_vm5, %v900_v22, %v811_v27 }
 0x19d   : > { %1891 = vmatmul.msk.f32.gmra.mxu0 %vm967_vm6, %v935_v57  ;;  %1937 = vmatmul.msk.f32.gmra.mxu3 %vm967_vm6, %v2712_v39 }
 0x19e   : > { %1924 = vmatmul.msk.f32.gmra.mxu1 %vm967_vm6, %v934_v38  ;;  %1959 = vmatmul.msk.f32.gmra.mxu2 %vm967_vm6, %v935_v57 }
 0x19f   : > { %v1329_v54 = vpop.f32.mrf.mxu2 }
 0x1a0   : > { %v2900_v32 = vpop.f32.mrf.mxu3  ;;  %v817_v8 = vpop.permute.xlu2 %816 }
 0x1a2   : > { %v1203_v63 = vpop.f32.mrf.mxu1  ;;  %v614_v28 = vpop.permute.xlu0 %613 }
 0x1a3   : > { %v901_v40 = vsel %vm880_vm4, %v2652_v58, %v614_v28  ;;  %v813_v10 = vpop.permute.xlu1 %812  ;;  %v902_v58 = vsel %vm880_vm4, %v2654_v59, %v616_v55 }
 0x1a4   : > { %v938_v2 = vsel %vm917_vm5, %v901_v40, %v813_v10 }
 0x1a5   : > { %1892 = vmatmul.msk.f32.gmra.mxu0 %vm967_vm6, %v936_v49  ;;  %1938 = vmatmul.msk.f32.gmra.mxu3 %vm967_vm6, %v2738_v4 }
 0x1a6   : > { %1925 = vmatmul.msk.f32.gmra.mxu1 %vm967_vm6, %v935_v57  ;;  %1960 = vmatmul.msk.f32.gmra.mxu2 %vm967_vm6, %v936_v49 }
 0x1a9   : > { %v1084_v24 = vpop.f32.mrf.mxu0 }
 0x1aa   : > { %v1204_v60 = vadd.f32 %v1203_v63, %v1084_v24  ;;  %v1206_v1 = vpop.f32.mrf.mxu1  ;;  %v815_v51 = vpop.permute.xlu0 %814 }
 0x1ab   : > { %v939_v43 = vsel %vm917_vm5, %v902_v58, %v815_v51  ;;  %v618_v29 = vpop.permute.xlu1 %617 }
 0x1ac   : > { %v1423_v13 = vadd.f32 %v1329_v54, %v1204_v60  ;;  %v903_v59 = vsel %vm880_vm4, %v2673_v20, %v618_v29  ;;  %v642_v54 = vpop.permute.xlu2 %641 }
 0x1ad   : > { %1893 = vmatmul.msk.f32.gmra.mxu0 %vm967_vm6, %v937_v44  ;;  %1939 = vmatmul.msk.f32.gmra.mxu3 %vm967_vm6, %v2757_v14  ;;  %v940_v38 = vsel %vm917_vm5, %v903_v59, %v817_v8 }
 0x1ae   : > { %v2884_v3 = vadd.f32 %v2850_v26, %v1423_v13  ;;  %1926 = vmatmul.msk.f32.gmra.mxu1 %vm967_vm6, %v936_v49  ;;  %1961 = vmatmul.msk.f32.gmra.mxu2 %vm967_vm6, %v937_v44 }
 0x1b1   : > { %v1087_v6 = vpop.f32.mrf.mxu0 }
 0x1b2   : > { %v1207_v31 = vadd.f32 %v1206_v1, %v1087_v6  ;;  %v1209_v53 = vpop.f32.mrf.mxu1  ;;  %v620_v45 = vpop.permute.xlu0 %619 }
 0x1b3   : > { %v904_v20 = vsel %vm880_vm4, %v2675_v5, %v620_v45  ;;  %v819_v46 = vpop.permute.xlu1 %818 }
 0x1b4   : > { %v941_v12 = vsel %vm917_vm5, %v904_v20, %v819_v46  ;;  %v843_v55 = vpop.permute.xlu2 %842 }
 0x1b5   : > { %1894 = vmatmul.msk.f32.gmra.mxu0 %vm967_vm6, %v938_v2  ;;  %1970 = vmatmul.msk.f32.vlgmr.msra.gmra.mxu3 %vm967_vm6, %v2689_v30 }
 0x1b6   : > { %1927 = vmatmul.msk.f32.gmra.mxu1 %vm967_vm6, %v937_v44  ;;  %1962 = vmatmul.msk.f32.gmra.mxu2 %vm967_vm6, %v938_v2 }
 0x1b7   : > { %v2913_v52 = vpop.f32.mrf.mxu3 }
 0x1b8   : > { %v1332_v7 = vpop.f32.mrf.mxu2 }
 0x1b9   : > { %v1424_v0 = vadd.f32 %v1332_v7, %v1207_v31  ;;  %v1090_v35 = vpop.f32.mrf.mxu0 }
 0x1ba   : > { %v1210_v34 = vadd.f32 %v1209_v53, %v1090_v35 }
 0x1bb   : > { %v2904_v21 = vadd.f32 %v2850_v26, %v1424_v0  ;;  %v1212_v30 = vpop.f32.mrf.mxu1 }
 0x1bd   : > { %1895 = vmatmul.msk.f32.gmra.mxu0 %vm967_vm6, %v939_v43  ;;  %1971 = vmatmul.msk.f32.gmra.mxu3 %vm967_vm6, %v2712_v39 }
 0x1be   : > { %1928 = vmatmul.msk.f32.gmra.mxu1 %vm967_vm6, %v938_v2  ;;  %1963 = vmatmul.msk.f32.gmra.mxu2 %vm967_vm6, %v939_v43 }
 0x1c0   : > { %v1335_v56 = vpop.f32.mrf.mxu2  ;;  %v2927_v48 = vpop.f32.mrf.mxu3 }
 0x1c1   : > { %v1425_v37 = vadd.f32 %v1335_v56, %v1210_v34  ;;  %v1093_v17 = vpop.f32.mrf.mxu0 }
 0x1c2   : > { %v1213_v9 = vadd.f32 %v1212_v30, %v1093_v17 }
 0x1c3   : > { %v2917_v41 = vadd.f32 %v2850_v26, %v1425_v37  ;;  %v1215_v39 = vpop.f32.mrf.mxu1 }
 0x1c5   : > { %1896 = vmatmul.msk.f32.gmra.mxu0 %vm967_vm6, %v940_v38  ;;  %1972 = vmatmul.msk.f32.gmra.mxu3 %vm967_vm6, %v2738_v4 }
 0x1c6   : > { %1929 = vmatmul.msk.f32.gmra.mxu1 %vm967_vm6, %v939_v43  ;;  %1964 = vmatmul.msk.f32.gmra.mxu2 %vm967_vm6, %v940_v38 }
 0x1c8   : > { %v1338_v42 = vpop.f32.mrf.mxu2 }
 0x1c9   : > { %v1426_v23 = vadd.f32 %v1338_v42, %v1213_v9  ;;  %v1096_v57 = vpop.f32.mrf.mxu0 }
 0x1ca   : > { %v1216_v25 = vadd.f32 %v1215_v39, %v1096_v57 }
 0x1cb   : > { %v2930_v63 = vadd.f32 %v2850_v26, %v1426_v23  ;;  %v1218_v4 = vpop.f32.mrf.mxu1 }
 0x1cd   : > { %1897 = vmatmul.msk.f32.gmra.mxu0 %vm967_vm6, %v941_v12  ;;  %1973 = vmatmul.msk.f32.gmra.mxu3 %vm967_vm6, %v2757_v14 }
 0x1ce   : > { %1930 = vmatmul.msk.f32.gmra.mxu1 %vm967_vm6, %v940_v38  ;;  %1965 = vmatmul.msk.f32.gmra.mxu2 %vm967_vm6, %v941_v12 }
 0x1cf   : > { %v2937_v18 = vpop.f32.mrf.mxu3 }
 0x1d1   : > { %v1099_v5 = vpop.f32.mrf.mxu0 }
 0x1d2   : > { %v1219_v49 = vadd.f32 %v1218_v4, %v1099_v5 }
 0x1d3   : > { %v1221_v22 = vpop.f32.mrf.mxu1 }
 0x1d5   : > { %1898 = vmatmul.msk.f32.gmra.mxu0 %vm967_vm6, %v2806_v62  ;;  %1974 = vmatmul.msk.f32.gmra.mxu3 %vm967_vm6, %v2775_v50  ;;  %v915_v50 = vsel %vm880_vm4, %v2744_v15, %v642_v54 }
 0x1d6   : > { %1931 = vmatmul.msk.f32.gmra.mxu1 %vm967_vm6, %v941_v12  ;;  %1966 = vmatmul.msk.f32.gmra.mxu2 %vm967_vm6, %v2806_v62  ;;  %v841_v62 = vpop.permute.xlu0 %840 }
 0x1d7   : > { %v2949_v13 = vpop.f32.mrf.mxu3  ;;  %v952_v31 = vsel %vm917_vm5, %v915_v50, %v841_v62 }
 0x1d8   : > { %v1341_v14 = vpop.f32.mrf.mxu2 }
 0x1d9   : > { %v1427_v27 = vadd.f32 %v1341_v14, %v1216_v25  ;;  %v1102_v24 = vpop.f32.mrf.mxu0 }
 0x1da   : > { %v1222_v60 = vadd.f32 %v1221_v22, %v1102_v24 }
 0x1db   : > { %v2947_v1 = vadd.f32 %v2850_v26, %v1427_v27  ;;  %v1224_v44 = vpop.f32.mrf.mxu1 }
 0x1dd   : > { %1899 = vmatmul.msk.f32.gmra.mxu0 %vm967_vm6, %v2821_v33  ;;  %1975 = vmatmul.msk.f32.gmra.mxu3 %vm967_vm6, %v2793_v61  ;;  %v644_v61 = vpop.permute.xlu1 %643 }
 0x1de   : > { %1967 = vmatmul.msk.f32.gmra.mxu2 %vm967_vm6, %v2821_v33  ;;  %v916_v33 = vsel %vm880_vm4, %v2746_v11, %v644_v61 }
 0x1df   : > { %v953_v35 = vsel %vm917_vm5, %v916_v33, %v843_v55 }
 0x1e0   : > { %v1344_v28 = vpop.f32.mrf.mxu2  ;;  %v2966_v15 = vpop.f32.mrf.mxu3 }
 0x1e1   : > { %v1428_v40 = vadd.f32 %v1344_v28, %v1219_v49  ;;  %v1105_v10 = vpop.f32.mrf.mxu0 }
 0x1e2   : > { %v1225_v6 = vadd.f32 %v1224_v44, %v1105_v10 }
 0x1e3   : > { %v2961_v53 = vadd.f32 %v2850_v26, %v1428_v40  ;;  %v1227_v2 = vpop.f32.mrf.mxu1 }
 0x1e5   : > { %1976 = vmatmul.msk.f32.gmra.mxu3 %vm967_vm6, %v952_v31 }
 0x1e6   : > { %1968 = vmatmul.msk.f32.gmra.mxu2 %vm967_vm6, %v2572_v36 }
 0x1e8   : > { %v1347_v58 = vpop.f32.mrf.mxu2 }
 0x1e9   : > { %v1429_v51 = vadd.f32 %v1347_v58, %v1222_v60  ;;  %v1108_v7 = vpop.f32.mrf.mxu0 }
 0x1ea   : > { %v1228_v0 = vadd.f32 %v1227_v2, %v1108_v7 }
 0x1eb   : > { %v2972_v34 = vadd.f32 %v2850_v26, %v1429_v51  ;;  %v1230_v43 = vpop.f32.mrf.mxu1 }
 0x1ed   : > { %1977 = vmatmul.msk.f32.gmra.mxu3 %vm967_vm6, %v953_v35 }
 0x1ee   : > { %1969 = vmatmul.msk.f32.gmra.mxu2 %vm967_vm6, %v2628_v16 }
 0x1ef   : > { %v2980_v36 = vpop.f32.mrf.mxu3 }
 0x1f1   : > { %v1111_v11 = vpop.f32.mrf.mxu0 }
 0x1f2   : > { %v1231_v30 = vadd.f32 %v1230_v43, %v1111_v11 }
 0x1f3   : > { %v1233_v29 = vpop.f32.mrf.mxu1 }
 0x1f7   : > { %v1272_v59 = vpop.f32.mrf.mxu3 }
 0x1f8   : > { %v1350_v8 = vpop.f32.mrf.mxu2 }
 0x1f9   : > { %v1430_v56 = vadd.f32 %v1350_v8, %v1225_v6  ;;  %v1114_v37 = vpop.f32.mrf.mxu0 }
 0x1fa   : > { %v1234_v17 = vadd.f32 %v1233_v29, %v1114_v37 }
 0x1fb   : > { %v2985_v16 = vadd.f32 %v2850_v26, %v1430_v56  ;;  %v1236_v9 = vpop.f32.mrf.mxu1 }
 0x200   : > { %v1353_v38 = vpop.f32.mrf.mxu2  ;;  %v1275_v39 = vpop.f32.mrf.mxu3 }
 0x201   : > { %v1431_v45 = vadd.f32 %v1353_v38, %v1228_v0 }
 0x202   : > { %v1117_v20 = vpop.f32.mrf.mxu0 }
 0x203   : > { %v2988_v46 = vadd.f32 %v2850_v26, %v1431_v45  ;;  %v1237_v42 = vadd.f32 %v1236_v9, %v1117_v20  ;;  %v1239_v23 = vpop.f32.mrf.mxu1  ;;  %v1273_v9 = vadd.f32 %v1272_v59, %v2890_v19 }
 0x208   : > { %v1278_v57 = vpop.f32.mrf.mxu3 }
 0x209   : > { %v1356_v25 = vpop.f32.mrf.mxu2 }
 0x20a   : > { %v1432_v12 = vadd.f32 %v1356_v25, %v1231_v30  ;;  %v1120_v4 = vpop.f32.mrf.mxu0 }
 0x20b   : > { %v1240_v5 = vadd.f32 %v1239_v23, %v1120_v4  ;;  %v1242_v22 = vpop.f32.mrf.mxu1 }
 0x20c   : > { %v2991_v49 = vadd.f32 %v2850_v26, %v1432_v12 }
 0x210   : > { %v1281_v14 = vpop.f32.mrf.mxu3 }
 0x211   : > { %v1359_v27 = vpop.f32.mrf.mxu2 }
 0x212   : > { %v1433_v24 = vadd.f32 %v1359_v27, %v1234_v17  ;;  %v1123_v60 = vpop.f32.mrf.mxu0 }
 0x213   : > { %v1243_v44 = vadd.f32 %v1242_v22, %v1123_v60  ;;  %v1245_v28 = vpop.f32.mrf.mxu1 }
 0x214   : > { %v2994_v54 = vadd.f32 %v2850_v26, %v1433_v24 }
 0x218   : > { %v1284_v50 = vpop.f32.mrf.mxu3 }
 0x219   : > { %v1362_v62 = vpop.f32.mrf.mxu2 }
 0x21a   : > { %v1434_v40 = vadd.f32 %v1362_v62, %v1237_v42  ;;  %v1126_v10 = vpop.f32.mrf.mxu0 }
 0x21b   : > { %v1246_v6 = vadd.f32 %v1245_v28, %v1126_v10  ;;  %v1248_v7 = vpop.f32.mrf.mxu1  ;;  %v1279_v28 = vadd.f32 %v1278_v57, %v2913_v52 }
 0x21c   : > { %v2997_v31 = vadd.f32 %v2850_v26, %v1434_v40 }
 0x220   : > { %v2999_v2 = vpop.f32.mrf.mxu3 }
 0x221   : > { %v1365_v61 = vpop.f32.mrf.mxu2 }
 0x222   : > { %v1435_v33 = vadd.f32 %v1365_v61, %v1240_v5  ;;  %v1129_v58 = vpop.f32.mrf.mxu0  ;;  %v1276_v5 = vadd.f32 %v1275_v39, %v2900_v32 }
 0x223   : > { %v1251_v37 = vpop.f32.mrf.mxu1  ;;  %v1249_v38 = vadd.f32 %v1248_v7, %v1129_v58 }
 0x224   : > { %v3002_v55 = vadd.f32 %v2850_v26, %v1435_v33 }
 0x228   : > { %v1290_v51 = vpop.f32.mrf.mxu3 }
 0x229   : > { %v3005_v0 = vadd.f32 %v1290_v51, %v2966_v15  ;;  %v1368_v35 = vpop.f32.mrf.mxu2  ;;  %v1282_v51 = vadd.f32 %v1281_v14, %v2927_v48 }
 0x22a   : > { %v1436_v43 = vadd.f32 %v1368_v35, %v1243_v44  ;;  %v1132_v29 = vpop.f32.mrf.mxu0 }
 0x22b   : > { %v1254_v4 = vpop.f32.mrf.mxu1  ;;  %v1252_v22 = vadd.f32 %v1251_v37, %v1132_v29 }
 0x22c   : > { %v3008_v11 = vadd.f32 %v2850_v26, %v1436_v43 }
 0x230   : > { %v3010_v30 = vpop.f32.mrf.mxu3 }
 0x231   : > { %v1371_v8 = vpop.f32.mrf.mxu2 }
 0x232   : > { %v1437_v56 = vadd.f32 %v1371_v8, %v1246_v6  ;;  %v1135_v23 = vpop.f32.mrf.mxu0 }
 0x233   : > { %v1257_v40 = vpop.f32.mrf.mxu1  ;;  %v1255_v10 = vadd.f32 %v1254_v4, %v1135_v23 }
 0x234   : > { %v3013_v17 = vadd.f32 %v2850_v26, %v1437_v56 }
 0x238   : > { %v1398_v45 = vpop.f32.mrf.mxu3 }
 0x239   : > { %v1374_v15 = vpop.f32.mrf.mxu2  ;;  %v1446_v20 = vadd.f32 %v1398_v45, %v1273_v9  ;;  %v1285_v9 = vadd.f32 %v1284_v50, %v2937_v18 }
 0x23a   : > { %v1438_v42 = vadd.f32 %v1374_v15, %v1249_v38  ;;  %v1138_v62 = vpop.f32.mrf.mxu0 }
 0x23b   : > { %v3017_v25 = vadd.f32 %v2850_v26, %v1446_v20  ;;  %v1258_v35 = vadd.f32 %v1257_v40, %v1138_v62  ;;  %v1260_v29 = vpop.f32.mrf.mxu1 }
 0x23c   : > { %v3020_v12 = vadd.f32 %v2850_v26, %v1438_v42 }
 0x240   : > { %v1401_v27 = vpop.f32.mrf.mxu3 }
 0x241   : > { %v1377_v24 = vpop.f32.mrf.mxu2  ;;  %v1447_v60 = vadd.f32 %v1401_v27, %v1276_v5  ;;  %v1288_v5 = vadd.f32 %v2999_v2, %v2949_v13 }
 0x242   : > { %v1439_v19 = vadd.f32 %v1377_v24, %v1252_v22  ;;  %v1141_v7 = vpop.f32.mrf.mxu0 }
 0x243   : > { %v3024_v59 = vadd.f32 %v2850_v26, %v1447_v60  ;;  %v1261_v38 = vadd.f32 %v1260_v29, %v1141_v7  ;;  %v1263_v42 = vpop.f32.mrf.mxu1 }
 0x244   : > { %v3027_v44 = vadd.f32 %v2850_v26, %v1439_v19 }
 0x248   : > { %v1404_v6 = vpop.f32.mrf.mxu3 }
 0x249   : > { %v1380_v61 = vpop.f32.mrf.mxu2  ;;  %v1448_v33 = vadd.f32 %v1404_v6, %v1279_v28 }
 0x24a   : > { %v1440_v32 = vadd.f32 %v1380_v61, %v1255_v10  ;;  %v1144_v15 = vpop.f32.mrf.mxu0 }
 0x24b   : > { %v3031_v39 = vadd.f32 %v2850_v26, %v1448_v33  ;;  %v1264_v22 = vadd.f32 %v1263_v42, %v1144_v15  ;;  %v1266_v28 = vpop.f32.mrf.mxu1 }
 0x24c   : > { %v3034_v58 = vadd.f32 %v2850_v26, %v1440_v32 }
 0x250   : > { %v1407_v43 = vpop.f32.mrf.mxu3 }
 0x251   : > { %v1383_v8 = vpop.f32.mrf.mxu2  ;;  %v1449_v52 = vadd.f32 %v1407_v43, %v1282_v51  ;;  %v1294_v51 = vadd.f32 %v3010_v30, %v2980_v36 }
 0x252   : > { %v1441_v57 = vadd.f32 %v1383_v8, %v1258_v35  ;;  %v1147_v60 = vpop.f32.mrf.mxu0 }
 0x253   : > { %v3038_v56 = vadd.f32 %v2850_v26, %v1449_v52  ;;  %v1267_v40 = vadd.f32 %v1266_v28, %v1147_v60  ;;  %v1269_v7 = vpop.f32.mrf.mxu1 }
 0x254   : > { %v3041_v37 = vadd.f32 %v2850_v26, %v1441_v57 }
 0x258   : > { %v1410_v45 = vpop.f32.mrf.mxu3 }
 0x259   : > { %v1386_v20 = vpop.f32.mrf.mxu2  ;;  %v1450_v48 = vadd.f32 %v1410_v45, %v1285_v9 }
 0x25a   : > { %v1442_v14 = vadd.f32 %v1386_v20, %v1261_v38  ;;  %v1150_v32 = vpop.f32.mrf.mxu0 }
 0x25b   : > { %v3045_v23 = vadd.f32 %v2850_v26, %v1450_v48  ;;  %v1270_v35 = vadd.f32 %v1269_v7, %v1150_v32 }
 0x25c   : > { %v3048_v4 = vadd.f32 %v2850_v26, %v1442_v14 }
 0x260   : > { %v1413_v27 = vpop.f32.mrf.mxu3 }
 0x261   : > { %v1389_v24 = vpop.f32.mrf.mxu2  ;;  %v1451_v18 = vadd.f32 %v1413_v27, %v1288_v5 }
 0x262   : > { %v1443_v50 = vadd.f32 %v1389_v24, %v1264_v22 }
 0x263   : > { %v3053_v19 = vadd.f32 %v2850_v26, %v1451_v18 }
 0x264   : > { %v3056_v62 = vadd.f32 %v2850_v26, %v1443_v50 }
 0x268   : > { %v1416_v10 = vpop.f32.mrf.mxu3 }
 0x269   : > { %v1392_v6 = vpop.f32.mrf.mxu2  ;;  %v1452_v61 = vadd.f32 %v1416_v10, %v3005_v0 }
 0x26a   : > { %v1444_v33 = vadd.f32 %v1392_v6, %v1267_v40 }
 0x26b   : > { %v3060_v13 = vadd.f32 %v2850_v26, %v1452_v61 }
 0x26c   : > { %v3063_v2 = vadd.f32 %v2850_v26, %v1444_v33 }
 0x270   : > { %v1419_v43 = vpop.f32.mrf.mxu3  ;;  %1506 = sbr.rel (%p1981_p10) target bundleno = 663 (0x297), region = 40 }
 0x271   : > { %v1395_v29 = vpop.f32.mrf.mxu2  ;;  %v1453_v8 = vadd.f32 %v1419_v43, %v1294_v51 }
 0x272   : > { %v1445_v52 = vadd.f32 %v1395_v29, %v1270_v35 }
 0x273   : > { %v3068_v57 = vadd.f32 %v2850_v26, %v1453_v8 }
 0x274   : > { %v3071_v0 = vadd.f32 %v2850_v26, %v1445_v52 }
 0x275   : > { %v1507_v9 = vmax.f32 %v2857_v47, 0.0  ;;  %v1508_v38 = vmax.f32 %v2884_v3, 0.0  ;;  %v1509_v36 = vmax.f32 %v2904_v21, 0.0  ;;  %v1510_v30 = vmax.f32 %v2917_v41, 0.0 }
 0x276   : > { %v1511_v45 = vmax.f32 %v2930_v63, 0.0  ;;  %v1512_v26 = vmax.f32 %v2947_v1, 0.0  ;;  %v1513_v15 = vmax.f32 %v2961_v53, 0.0  ;;  %v1514_v20 = vmax.f32 %v2972_v34, 0.0 }
 0x277   : > { %1540 = vst.msk [vmem:[#allocation2 + $0x19] sm:$0xff] %vm880_vm4, %v1507_v9  ;;  %v1515_v48 = vmax.f32 %v2985_v16, 0.0  ;;  %v1516_v14 = vmax.f32 %v2988_v46, 0.0  ;;  %v1517_v42 = vmax.f32 %v2991_v49, 0.0  ;;  %v1518_v5 = vmax.f32 %v2994_v54, 0.0 }
 0x278   : > { %1541 = vst.msk [vmem:[#allocation2 + $0x21] sm:$0xff] %vm880_vm4, %v1508_v38  ;;  %v1519_v22 = vmax.f32 %v2997_v31, 0.0  ;;  %v1520_v27 = vmax.f32 %v3002_v55, 0.0  ;;  %v1521_v24 = vmax.f32 %v3008_v11, 0.0  ;;  %v1522_v18 = vmax.f32 %v3013_v17, 0.0 }
 0x279   : > { %1542 = vst.msk [vmem:[#allocation2 + $0x31] sm:$0xff] %vm880_vm4, %v1509_v36  ;;  %v1523_v50 = vmax.f32 %v3020_v12, 0.0  ;;  %v1524_v60 = vmax.f32 %v3027_v44, 0.0  ;;  %v1525_v28 = vmax.f32 %v3034_v58, 0.0  ;;  %v1526_v40 = vmax.f32 %v3041_v37, 0.0 }
 0x27a   : > { %1543 = vst.msk [vmem:[#allocation2 + $0x39] sm:$0xff] %vm880_vm4, %v1510_v30  ;;  %v1527_v10 = vmax.f32 %v3048_v4, 0.0  ;;  %v1528_v6 = vmax.f32 %v3056_v62, 0.0  ;;  %v1529_v61 = vmax.f32 %v3063_v2, 0.0  ;;  %v1530_v33 = vmax.f32 %v3071_v0, 0.0 }
 0x27b   : > { %1544 = vst.msk [vmem:[#allocation2 + $0x49] sm:$0xff] %vm880_vm4, %v1511_v45  ;;  %v1531_v32 = vmax.f32 %v3017_v25, 0.0  ;;  %v1532_v51 = vmax.f32 %v3024_v59, 0.0  ;;  %v1533_v7 = vmax.f32 %v3031_v39, 0.0  ;;  %v1534_v35 = vmax.f32 %v3038_v56, 0.0 }
 0x27c   : > { %1545 = vst.msk [vmem:[#allocation2 + $0x51] sm:$0xff] %vm880_vm4, %v1512_v26  ;;  %v1535_v43 = vmax.f32 %v3045_v23, 0.0  ;;  %v1536_v29 = vmax.f32 %v3053_v19, 0.0  ;;  %v1537_v8 = vmax.f32 %v3060_v13, 0.0  ;;  %v1538_v52 = vmax.f32 %v3068_v57, 0.0 }
 0x27d   : > { %1546 = vst.msk [vmem:[#allocation2 + $0x61] sm:$0xff] %vm880_vm4, %v1513_v15 }
 0x27e   : > { %1547 = vst.msk [vmem:[#allocation2 + $0x69] sm:$0xff] %vm880_vm4, %v1514_v20 }
 0x27f   : > { %1548 = vst.msk [vmem:[#allocation2 + $0x79] sm:$0xff] %vm880_vm4, %v1515_v48 }
 0x280   : > { %1549 = vst.msk [vmem:[#allocation2 + $0x81] sm:$0xff] %vm880_vm4, %v1516_v14 }
 0x281   : > { %1550 = vst.msk [vmem:[#allocation2 + $0x91] sm:$0xff] %vm880_vm4, %v1517_v42 }
 0x282   : > { %1551 = vst.msk [vmem:[#allocation2 + $0x99] sm:$0xff] %vm880_vm4, %v1518_v5 }
 0x283   : > { %1552 = vst.msk [vmem:[#allocation2 + $0xa9] sm:$0xff] %vm880_vm4, %v1519_v22 }
 0x284   : > { %1553 = vst.msk [vmem:[#allocation2 + $0xb1] sm:$0xff] %vm880_vm4, %v1520_v27 }
 0x285   : > { %1554 = vst.msk [vmem:[#allocation2 + $0xc1] sm:$0xff] %vm880_vm4, %v1521_v24 }
 0x286   : > { %1555 = vst.msk [vmem:[#allocation2 + $0xc9] sm:$0xff] %vm880_vm4, %v1522_v18 }
 0x287   : > { %1556 = vst.msk [vmem:[#allocation2 + $0xd9] sm:$0xff] %vm880_vm4, %v1523_v50 }
 0x288   : > { %1557 = vst.msk [vmem:[#allocation2 + $0xe1] sm:$0xff] %vm880_vm4, %v1524_v60 }
 0x289   : > { %1558 = vst.msk [vmem:[#allocation2 + $0xf1] sm:$0xff] %vm880_vm4, %v1525_v28 }
 0x28a   : > { %1559 = vst.msk [vmem:[#allocation2 + $0xf9] sm:$0xff] %vm880_vm4, %v1526_v40 }
 0x28b   : > { %1560 = vst.msk [vmem:[#allocation2 + $0x109] sm:$0xff] %vm880_vm4, %v1527_v10 }
 0x28c   : > { %1561 = vst.msk [vmem:[#allocation2 + $0x111] sm:$0xff] %vm880_vm4, %v1528_v6 }
 0x28d   : > { %1562 = vst.msk [vmem:[#allocation2 + $0x121] sm:$0xff] %vm880_vm4, %v1529_v61 }
 0x28e   : > { %1563 = vst.msk [vmem:[#allocation2 + $0x129] sm:$0xff] %vm880_vm4, %v1530_v33 }
 0x28f   : > { %1564 = vst.msk [vmem:[#allocation2 + $0x139] sm:$0xff] %vm880_vm4, %v1531_v32 }
 0x290   : > { %1565 = vst.msk [vmem:[#allocation2 + $0x141] sm:$0xff] %vm880_vm4, %v1532_v51 }
 0x291   : > { %1566 = vst.msk [vmem:[#allocation2 + $0x151] sm:$0xff] %vm880_vm4, %v1533_v7 }
 0x292   : > { %1567 = vst.msk [vmem:[#allocation2 + $0x159] sm:$0xff] %vm880_vm4, %v1534_v35 }
 0x293   : > { %1568 = vst.msk [vmem:[#allocation2 + $0x169] sm:$0xff] %vm880_vm4, %v1535_v43 }
 0x294   : > { %1569 = vst.msk [vmem:[#allocation2 + $0x171] sm:$0xff] %vm880_vm4, %v1536_v29 }
 0x295   : > { %1570 = vst.msk [vmem:[#allocation2 + $0x181] sm:$0xff] %vm880_vm4, %v1537_v8 }
 0x296   : > { %1571 = vst.msk [vmem:[#allocation2 + $0x189] sm:$0xff] %vm880_vm4, %v1538_v52 }
 0x297 PF: > { %p1982_p11 = scmp.ne.s32.totalorder %s3334_s21, 3 }
 0x299   : > { %1574 = sbr.rel (%p1982_p11) target bundleno = 737 (0x2e1), region = 44 }
 0x29e   : > { %v1575_v9 = vld [vmem:[#allocation3] sm:$0xff]  ;;  %v1576_v38 = vld [vmem:[#allocation3 + $0x8] sm:$0xff]  ;;  %v1577_v36 = vld [vmem:[#allocation3 + $0x10] sm:$0xff] }
 0x29f   : > { %v1607_v30 = vsub.f32 %v1575_v9, %v2857_v47  ;;  %v1608_v45 = vsub.f32 %v1576_v38, %v2884_v3  ;;  %v1578_v26 = vld [vmem:[#allocation3 + $0x18] sm:$0xff]  ;;  %v1609_v15 = vsub.f32 %v1577_v36, %v2904_v21  ;;  %v1579_v20 = vld [vmem:[#allocation3 + $0x20] sm:$0xff]  ;;  %v1580_v14 = vld [vmem:[#allocation3 + $0x28] sm:$0xff] }
 0x2a0   : > { %v1610_v48 = vsub.f32 %v1578_v26, %v2917_v41  ;;  %v1611_v47 = vsub.f32 %v1579_v20, %v2930_v63  ;;  %v1581_v3 = vld [vmem:[#allocation3 + $0x30] sm:$0xff]  ;;  %v1612_v21 = vsub.f32 %v1580_v14, %v2947_v1  ;;  %v1582_v42 = vld [vmem:[#allocation3 + $0x38] sm:$0xff]  ;;  %v1583_v5 = vld [vmem:[#allocation3 + $0x40] sm:$0xff] }
 0x2a1   : > { %1640 = vst.msk [vmem:[#allocation2 + $0x19] sm:$0xff] %vm880_vm4, %v1607_v30  ;;  %v1613_v41 = vsub.f32 %v1581_v3, %v2961_v53  ;;  %v1614_v63 = vsub.f32 %v1582_v42, %v2972_v34  ;;  %v1584_v22 = vld [vmem:[#allocation3 + $0x48] sm:$0xff]  ;;  %v1615_v1 = vsub.f32 %v1583_v5, %v2985_v16  ;;  %v1585_v27 = vld [vmem:[#allocation3 + $0x50] sm:$0xff]  ;;  %v1586_v24 = vld [vmem:[#allocation3 + $0x58] sm:$0xff] }
 0x2a2   : > { %1672 = vst.msk [vmem:[#allocation3] sm:$0xff] %vm880_vm4, %v1607_v30  ;;  %v1616_v53 = vsub.f32 %v1584_v22, %v2988_v46  ;;  %v1617_v34 = vsub.f32 %v1585_v27, %v2991_v49  ;;  %v1587_v18 = vld [vmem:[#allocation3 + $0x60] sm:$0xff]  ;;  %v1618_v16 = vsub.f32 %v1586_v24, %v2994_v54  ;;  %v1588_v50 = vld [vmem:[#allocation3 + $0x68] sm:$0xff]  ;;  %v1589_v60 = vld [vmem:[#allocation3 + $0x70] sm:$0xff] }
 0x2a3   : > { %1641 = vst.msk [vmem:[#allocation2 + $0x21] sm:$0xff] %vm880_vm4, %v1608_v45  ;;  %v1619_v46 = vsub.f32 %v1587_v18, %v2997_v31  ;;  %v1620_v49 = vsub.f32 %v1588_v50, %v3002_v55  ;;  %v1590_v28 = vld [vmem:[#allocation3 + $0x78] sm:$0xff]  ;;  %v1621_v54 = vsub.f32 %v1589_v60, %v3008_v11  ;;  %v1591_v40 = vld [vmem:[#allocation3 + $0x80] sm:$0xff]  ;;  %v1592_v10 = vld [vmem:[#allocation3 + $0x88] sm:$0xff] }
 0x2a4   : > { %1673 = vst.msk [vmem:[#allocation3 + $0x8] sm:$0xff] %vm880_vm4, %v1608_v45  ;;  %v1622_v31 = vsub.f32 %v1590_v28, %v3013_v17  ;;  %v1623_v55 = vsub.f32 %v1591_v40, %v3020_v12  ;;  %v1593_v6 = vld [vmem:[#allocation3 + $0x90] sm:$0xff]  ;;  %v1624_v11 = vsub.f32 %v1592_v10, %v3027_v44  ;;  %v1594_v61 = vld [vmem:[#allocation3 + $0x98] sm:$0xff]  ;;  %v1595_v33 = vld [vmem:[#allocation3 + $0xa0] sm:$0xff] }
 0x2a5   : > { %1642 = vst.msk [vmem:[#allocation2 + $0x31] sm:$0xff] %vm880_vm4, %v1609_v15  ;;  %v1625_v17 = vsub.f32 %v1593_v6, %v3034_v58  ;;  %v1626_v12 = vsub.f32 %v1594_v61, %v3041_v37  ;;  %v1596_v32 = vld [vmem:[#allocation3 + $0xa8] sm:$0xff]  ;;  %v1627_v44 = vsub.f32 %v1595_v33, %v3048_v4  ;;  %v1597_v51 = vld [vmem:[#allocation3 + $0xb0] sm:$0xff]  ;;  %v1598_v7 = vld [vmem:[#allocation3 + $0xb8] sm:$0xff] }
 0x2a6   : > { %1674 = vst.msk [vmem:[#allocation3 + $0x10] sm:$0xff] %vm880_vm4, %v1609_v15  ;;  %v1628_v58 = vsub.f32 %v1596_v32, %v3056_v62  ;;  %v1629_v37 = vsub.f32 %v1597_v51, %v3063_v2  ;;  %v1599_v35 = vld [vmem:[#allocation3 + $0xc0] sm:$0xff]  ;;  %v1630_v4 = vsub.f32 %v1598_v7, %v3071_v0  ;;  %v1600_v43 = vld [vmem:[#allocation3 + $0xc8] sm:$0xff]  ;;  %v1601_v29 = vld [vmem:[#allocation3 + $0xd0] sm:$0xff] }
 0x2a7   : > { %1643 = vst.msk [vmem:[#allocation2 + $0x39] sm:$0xff] %vm880_vm4, %v1610_v48  ;;  %v1631_v62 = vsub.f32 %v1599_v35, %v3017_v25  ;;  %v1632_v2 = vsub.f32 %v1600_v43, %v3024_v59  ;;  %v1602_v8 = vld [vmem:[#allocation3 + $0xd8] sm:$0xff]  ;;  %v1633_v0 = vsub.f32 %v1601_v29, %v3031_v39  ;;  %v1603_v52 = vld [vmem:[#allocation3 + $0xe0] sm:$0xff]  ;;  %v1604_v9 = vld [vmem:[#allocation3 + $0xe8] sm:$0xff] }
 0x2a8   : > { %1675 = vst.msk [vmem:[#allocation3 + $0x18] sm:$0xff] %vm880_vm4, %v1610_v48  ;;  %v1634_v25 = vsub.f32 %v1602_v8, %v3038_v56  ;;  %v1635_v59 = vsub.f32 %v1603_v52, %v3045_v23  ;;  %v1605_v38 = vld [vmem:[#allocation3 + $0xf0] sm:$0xff]  ;;  %v1636_v39 = vsub.f32 %v1604_v9, %v3053_v19  ;;  %v1606_v36 = vld [vmem:[#allocation3 + $0xf8] sm:$0xff] }
 0x2a9   : > { %1644 = vst.msk [vmem:[#allocation2 + $0x49] sm:$0xff] %vm880_vm4, %v1611_v47  ;;  %v1637_v56 = vsub.f32 %v1605_v38, %v3060_v13  ;;  %v1638_v23 = vsub.f32 %v1606_v36, %v3068_v57 }
 0x2aa   : > { %1676 = vst.msk [vmem:[#allocation3 + $0x20] sm:$0xff] %vm880_vm4, %v1611_v47 }
 0x2ab   : > { %1645 = vst.msk [vmem:[#allocation2 + $0x51] sm:$0xff] %vm880_vm4, %v1612_v21 }
 0x2ac   : > { %1677 = vst.msk [vmem:[#allocation3 + $0x28] sm:$0xff] %vm880_vm4, %v1612_v21 }
 0x2ad   : > { %1646 = vst.msk [vmem:[#allocation2 + $0x61] sm:$0xff] %vm880_vm4, %v1613_v41 }
 0x2ae   : > { %1678 = vst.msk [vmem:[#allocation3 + $0x30] sm:$0xff] %vm880_vm4, %v1613_v41 }
 0x2af   : > { %1647 = vst.msk [vmem:[#allocation2 + $0x69] sm:$0xff] %vm880_vm4, %v1614_v63 }
 0x2b0   : > { %1679 = vst.msk [vmem:[#allocation3 + $0x38] sm:$0xff] %vm880_vm4, %v1614_v63 }
 0x2b1   : > { %1648 = vst.msk [vmem:[#allocation2 + $0x79] sm:$0xff] %vm880_vm4, %v1615_v1 }
 0x2b2   : > { %1680 = vst.msk [vmem:[#allocation3 + $0x40] sm:$0xff] %vm880_vm4, %v1615_v1 }
 0x2b3   : > { %1649 = vst.msk [vmem:[#allocation2 + $0x81] sm:$0xff] %vm880_vm4, %v1616_v53 }
 0x2b4   : > { %1681 = vst.msk [vmem:[#allocation3 + $0x48] sm:$0xff] %vm880_vm4, %v1616_v53 }
 0x2b5   : > { %1650 = vst.msk [vmem:[#allocation2 + $0x91] sm:$0xff] %vm880_vm4, %v1617_v34 }
 0x2b6   : > { %1682 = vst.msk [vmem:[#allocation3 + $0x50] sm:$0xff] %vm880_vm4, %v1617_v34 }
 0x2b7   : > { %1651 = vst.msk [vmem:[#allocation2 + $0x99] sm:$0xff] %vm880_vm4, %v1618_v16 }
 0x2b8   : > { %1683 = vst.msk [vmem:[#allocation3 + $0x58] sm:$0xff] %vm880_vm4, %v1618_v16 }
 0x2b9   : > { %1652 = vst.msk [vmem:[#allocation2 + $0xa9] sm:$0xff] %vm880_vm4, %v1619_v46 }
 0x2ba   : > { %1684 = vst.msk [vmem:[#allocation3 + $0x60] sm:$0xff] %vm880_vm4, %v1619_v46 }
 0x2bb   : > { %1653 = vst.msk [vmem:[#allocation2 + $0xb1] sm:$0xff] %vm880_vm4, %v1620_v49 }
 0x2bc   : > { %1685 = vst.msk [vmem:[#allocation3 + $0x68] sm:$0xff] %vm880_vm4, %v1620_v49 }
 0x2bd   : > { %1654 = vst.msk [vmem:[#allocation2 + $0xc1] sm:$0xff] %vm880_vm4, %v1621_v54 }
 0x2be   : > { %1686 = vst.msk [vmem:[#allocation3 + $0x70] sm:$0xff] %vm880_vm4, %v1621_v54 }
 0x2bf   : > { %1655 = vst.msk [vmem:[#allocation2 + $0xc9] sm:$0xff] %vm880_vm4, %v1622_v31 }
 0x2c0   : > { %1687 = vst.msk [vmem:[#allocation3 + $0x78] sm:$0xff] %vm880_vm4, %v1622_v31 }
 0x2c1   : > { %1656 = vst.msk [vmem:[#allocation2 + $0xd9] sm:$0xff] %vm880_vm4, %v1623_v55 }
 0x2c2   : > { %1688 = vst.msk [vmem:[#allocation3 + $0x80] sm:$0xff] %vm880_vm4, %v1623_v55 }
 0x2c3   : > { %1657 = vst.msk [vmem:[#allocation2 + $0xe1] sm:$0xff] %vm880_vm4, %v1624_v11 }
 0x2c4   : > { %1689 = vst.msk [vmem:[#allocation3 + $0x88] sm:$0xff] %vm880_vm4, %v1624_v11 }
 0x2c5   : > { %1658 = vst.msk [vmem:[#allocation2 + $0xf1] sm:$0xff] %vm880_vm4, %v1625_v17 }
 0x2c6   : > { %1690 = vst.msk [vmem:[#allocation3 + $0x90] sm:$0xff] %vm880_vm4, %v1625_v17 }
 0x2c7   : > { %1659 = vst.msk [vmem:[#allocation2 + $0xf9] sm:$0xff] %vm880_vm4, %v1626_v12 }
 0x2c8   : > { %1691 = vst.msk [vmem:[#allocation3 + $0x98] sm:$0xff] %vm880_vm4, %v1626_v12 }
 0x2c9   : > { %1660 = vst.msk [vmem:[#allocation2 + $0x109] sm:$0xff] %vm880_vm4, %v1627_v44 }
 0x2ca   : > { %1692 = vst.msk [vmem:[#allocation3 + $0xa0] sm:$0xff] %vm880_vm4, %v1627_v44 }
 0x2cb   : > { %1661 = vst.msk [vmem:[#allocation2 + $0x111] sm:$0xff] %vm880_vm4, %v1628_v58 }
 0x2cc   : > { %1693 = vst.msk [vmem:[#allocation3 + $0xa8] sm:$0xff] %vm880_vm4, %v1628_v58 }
 0x2cd   : > { %1662 = vst.msk [vmem:[#allocation2 + $0x121] sm:$0xff] %vm880_vm4, %v1629_v37 }
 0x2ce   : > { %1694 = vst.msk [vmem:[#allocation3 + $0xb0] sm:$0xff] %vm880_vm4, %v1629_v37 }
 0x2cf   : > { %1663 = vst.msk [vmem:[#allocation2 + $0x129] sm:$0xff] %vm880_vm4, %v1630_v4 }
 0x2d0   : > { %1695 = vst.msk [vmem:[#allocation3 + $0xb8] sm:$0xff] %vm880_vm4, %v1630_v4 }
 0x2d1   : > { %1664 = vst.msk [vmem:[#allocation2 + $0x139] sm:$0xff] %vm880_vm4, %v1631_v62 }
 0x2d2   : > { %1696 = vst.msk [vmem:[#allocation3 + $0xc0] sm:$0xff] %vm880_vm4, %v1631_v62 }
 0x2d3   : > { %1665 = vst.msk [vmem:[#allocation2 + $0x141] sm:$0xff] %vm880_vm4, %v1632_v2 }
 0x2d4   : > { %1697 = vst.msk [vmem:[#allocation3 + $0xc8] sm:$0xff] %vm880_vm4, %v1632_v2 }
 0x2d5   : > { %1666 = vst.msk [vmem:[#allocation2 + $0x151] sm:$0xff] %vm880_vm4, %v1633_v0 }
 0x2d6   : > { %1698 = vst.msk [vmem:[#allocation3 + $0xd0] sm:$0xff] %vm880_vm4, %v1633_v0 }
 0x2d7   : > { %1667 = vst.msk [vmem:[#allocation2 + $0x159] sm:$0xff] %vm880_vm4, %v1634_v25 }
 0x2d8   : > { %1699 = vst.msk [vmem:[#allocation3 + $0xd8] sm:$0xff] %vm880_vm4, %v1634_v25 }
 0x2d9   : > { %1668 = vst.msk [vmem:[#allocation2 + $0x169] sm:$0xff] %vm880_vm4, %v1635_v59 }
 0x2da   : > { %1700 = vst.msk [vmem:[#allocation3 + $0xe0] sm:$0xff] %vm880_vm4, %v1635_v59 }
 0x2db   : > { %1669 = vst.msk [vmem:[#allocation2 + $0x171] sm:$0xff] %vm880_vm4, %v1636_v39 }
 0x2dc   : > { %1701 = vst.msk [vmem:[#allocation3 + $0xe8] sm:$0xff] %vm880_vm4, %v1636_v39 }
 0x2dd   : > { %1670 = vst.msk [vmem:[#allocation2 + $0x181] sm:$0xff] %vm880_vm4, %v1637_v56 }
 0x2de   : > { %1702 = vst.msk [vmem:[#allocation3 + $0xf0] sm:$0xff] %vm880_vm4, %v1637_v56 }
 0x2df   : > { %1671 = vst.msk [vmem:[#allocation2 + $0x189] sm:$0xff] %vm880_vm4, %v1638_v23 }
 0x2e0   : > { %1703 = vst.msk [vmem:[#allocation3 + $0xf8] sm:$0xff] %vm880_vm4, %v1638_v23 }
 0x2e1 PF: > { %p1983_p12 = scmp.ne.s32.totalorder %s2073_s12, 11 }
 0x2e3   : > { %1707 = sbr.rel (%p1983_p12) target bundleno = 777 (0x309), region = 48 }
 0x2e8   : > { %v1708_v19 = vld [vmem:[#allocation3] sm:$0xff]  ;;  %v1709_v13 = vld [vmem:[#allocation3 + $0x8] sm:$0xff]  ;;  %v1710_v57 = vld [vmem:[#allocation3 + $0x10] sm:$0xff] }
 0x2e9   : > { %1740 = vst.msk [vmem:[%s2163_s30] sm:$0xff] %vm880_vm4, %v1708_v19  ;;  %v1711_v30 = vld [vmem:[#allocation3 + $0x18] sm:$0xff]  ;;  %v1712_v45 = vld [vmem:[#allocation3 + $0x20] sm:$0xff]  ;;  %v1713_v26 = vld [vmem:[#allocation3 + $0x28] sm:$0xff] }
 0x2ea   : > { %1741 = vst.msk [vmem:[%s2163_s30 + $0x8] sm:$0xff] %vm880_vm4, %v1709_v13  ;;  %v1714_v15 = vld [vmem:[#allocation3 + $0x30] sm:$0xff]  ;;  %v1715_v20 = vld [vmem:[#allocation3 + $0x38] sm:$0xff]  ;;  %v1716_v48 = vld [vmem:[#allocation3 + $0x40] sm:$0xff] }
 0x2eb   : > { %1742 = vst.msk [vmem:[%s2163_s30 + $0x10] sm:$0xff] %vm880_vm4, %v1710_v57  ;;  %v1717_v14 = vld [vmem:[#allocation3 + $0x48] sm:$0xff]  ;;  %v1718_v47 = vld [vmem:[#allocation3 + $0x50] sm:$0xff]  ;;  %v1719_v3 = vld [vmem:[#allocation3 + $0x58] sm:$0xff] }
 0x2ec   : > { %1743 = vst.msk [vmem:[%s2163_s30 + $0x18] sm:$0xff] %vm880_vm4, %v1711_v30  ;;  %v1720_v21 = vld [vmem:[#allocation3 + $0x60] sm:$0xff]  ;;  %v1721_v42 = vld [vmem:[#allocation3 + $0x68] sm:$0xff]  ;;  %v1722_v41 = vld [vmem:[#allocation3 + $0x70] sm:$0xff] }
 0x2ed   : > { %1744 = vst.msk [vmem:[%s2163_s30 + $0x20] sm:$0xff] %vm880_vm4, %v1712_v45  ;;  %v1723_v5 = vld [vmem:[#allocation3 + $0x78] sm:$0xff]  ;;  %v1724_v63 = vld [vmem:[#allocation3 + $0x80] sm:$0xff]  ;;  %v1725_v22 = vld [vmem:[#allocation3 + $0x88] sm:$0xff] }
 0x2ee   : > { %1745 = vst.msk [vmem:[%s2163_s30 + $0x28] sm:$0xff] %vm880_vm4, %v1713_v26  ;;  %v1726_v1 = vld [vmem:[#allocation3 + $0x90] sm:$0xff]  ;;  %v1727_v27 = vld [vmem:[#allocation3 + $0x98] sm:$0xff]  ;;  %v1728_v53 = vld [vmem:[#allocation3 + $0xa0] sm:$0xff] }
 0x2ef   : > { %1746 = vst.msk [vmem:[%s2163_s30 + $0x30] sm:$0xff] %vm880_vm4, %v1714_v15  ;;  %v1729_v24 = vld [vmem:[#allocation3 + $0xa8] sm:$0xff]  ;;  %v1730_v34 = vld [vmem:[#allocation3 + $0xb0] sm:$0xff]  ;;  %v1731_v18 = vld [vmem:[#allocation3 + $0xb8] sm:$0xff] }
 0x2f0   : > { %1747 = vst.msk [vmem:[%s2163_s30 + $0x38] sm:$0xff] %vm880_vm4, %v1715_v20  ;;  %v1732_v16 = vld [vmem:[#allocation3 + $0xc0] sm:$0xff]  ;;  %v1733_v50 = vld [vmem:[#allocation3 + $0xc8] sm:$0xff]  ;;  %v1734_v46 = vld [vmem:[#allocation3 + $0xd0] sm:$0xff] }
 0x2f1   : > { %1748 = vst.msk [vmem:[%s2163_s30 + $0x40] sm:$0xff] %vm880_vm4, %v1716_v48  ;;  %v1735_v60 = vld [vmem:[#allocation3 + $0xd8] sm:$0xff]  ;;  %v1736_v49 = vld [vmem:[#allocation3 + $0xe0] sm:$0xff]  ;;  %v1737_v28 = vld [vmem:[#allocation3 + $0xe8] sm:$0xff] }
 0x2f2   : > { %1749 = vst.msk [vmem:[%s2163_s30 + $0x48] sm:$0xff] %vm880_vm4, %v1717_v14  ;;  %v1738_v54 = vld [vmem:[#allocation3 + $0xf0] sm:$0xff]  ;;  %v1739_v40 = vld [vmem:[#allocation3 + $0xf8] sm:$0xff] }
 0x2f3   : > { %1750 = vst.msk [vmem:[%s2163_s30 + $0x50] sm:$0xff] %vm880_vm4, %v1718_v47 }
 0x2f4   : > { %1751 = vst.msk [vmem:[%s2163_s30 + $0x58] sm:$0xff] %vm880_vm4, %v1719_v3 }
 0x2f5   : > { %1752 = vst.msk [vmem:[%s2163_s30 + $0x60] sm:$0xff] %vm880_vm4, %v1720_v21 }
 0x2f6   : > { %1753 = vst.msk [vmem:[%s2163_s30 + $0x68] sm:$0xff] %vm880_vm4, %v1721_v42 }
 0x2f7   : > { %1754 = vst.msk [vmem:[%s2163_s30 + $0x70] sm:$0xff] %vm880_vm4, %v1722_v41 }
 0x2f8   : > { %1755 = vst.msk [vmem:[%s2163_s30 + $0x78] sm:$0xff] %vm880_vm4, %v1723_v5 }
 0x2f9   : > { %1756 = vst.msk [vmem:[%s2163_s30 + $0x80] sm:$0xff] %vm880_vm4, %v1724_v63 }
 0x2fa   : > { %1757 = vst.msk [vmem:[%s2163_s30 + $0x88] sm:$0xff] %vm880_vm4, %v1725_v22 }
 0x2fb   : > { %1758 = vst.msk [vmem:[%s2163_s30 + $0x90] sm:$0xff] %vm880_vm4, %v1726_v1 }
 0x2fc   : > { %1759 = vst.msk [vmem:[%s2163_s30 + $0x98] sm:$0xff] %vm880_vm4, %v1727_v27 }
 0x2fd   : > { %1760 = vst.msk [vmem:[%s2163_s30 + $0xa0] sm:$0xff] %vm880_vm4, %v1728_v53 }
 0x2fe   : > { %1761 = vst.msk [vmem:[%s2163_s30 + $0xa8] sm:$0xff] %vm880_vm4, %v1729_v24 }
 0x2ff   : > { %1762 = vst.msk [vmem:[%s2163_s30 + $0xb0] sm:$0xff] %vm880_vm4, %v1730_v34 }
 0x300   : > { %1763 = vst.msk [vmem:[%s2163_s30 + $0xb8] sm:$0xff] %vm880_vm4, %v1731_v18 }
 0x301   : > { %1764 = vst.msk [vmem:[%s2163_s30 + $0xc0] sm:$0xff] %vm880_vm4, %v1732_v16 }
 0x302   : > { %1765 = vst.msk [vmem:[%s2163_s30 + $0xc8] sm:$0xff] %vm880_vm4, %v1733_v50 }
 0x303   : > { %1766 = vst.msk [vmem:[%s2163_s30 + $0xd0] sm:$0xff] %vm880_vm4, %v1734_v46 }
 0x304   : > { %1767 = vst.msk [vmem:[%s2163_s30 + $0xd8] sm:$0xff] %vm880_vm4, %v1735_v60 }
 0x305   : > { %1768 = vst.msk [vmem:[%s2163_s30 + $0xe0] sm:$0xff] %vm880_vm4, %v1736_v49 }
 0x306   : > { %1769 = vst.msk [vmem:[%s2163_s30 + $0xe8] sm:$0xff] %vm880_vm4, %v1737_v28 }
 0x307   : > { %1770 = vst.msk [vmem:[%s2163_s30 + $0xf0] sm:$0xff] %vm880_vm4, %v1738_v54 }
 0x308   : > { %1771 = vst.msk [vmem:[%s2163_s30 + $0xf8] sm:$0xff] %vm880_vm4, %v1739_v40 }
 0x309 PF: > { %s13_s16 = sadd.s32 1, %s2089_s16   ;;  %s3319_s12 = smov %s2081_s14 }
 0x30a   : > { %p10_p13 = scmp.ge.s32.totalorder %s13_s16, 26   ;;  %s3320_s13 = smov %s2085_s15 }
 0x30b   : > { %s3321_s14 = smov %s3324_s17  ;;  %s3322_s15 = smov %s3328_s18 }
 0x30c   :  { %12 = sbr.rel (!%p10_p13) target bundleno = 3 (0x3), region = 89 }

</bundles_post_ra>
